<compile_context>
chip_gen: v5e
topology: v5e:2x2
jax: 0.10.0
libtpu: 0.0.40
codegen_flags: <defaults>
</compile_context>

<pallas_src>
import functools
import math

import jax
import jax.numpy as jnp
from jax.experimental import pallas as pl
from jax.experimental.pallas import tpu as pltpu

# find_ab_params(spread=1.0, min_dist=0.01): the PyTorch module fits these with
# scipy.optimize.curve_fit at __init__ time.  Deterministic constants for the
# default hyperparameters, precomputed offline with the same procedure.
# TODO(synk): scipy curve_fit has no Pallas equivalent (host-side, init-time
# only); these constants are only valid for spread=1.0, min_dist=0.01.
UMAP_A = 1.9290892
UMAP_B = 0.7915397

_LANES = 128
_EPS = 1e-4


def _round_up(x, m):
    return ((x + m - 1) // m) * m


def _cdiv(a, b):
    return -(-a // b)


def _vmem_capacity_bytes():
    try:
        return int(pltpu.get_tpu_info().vmem_capacity_bytes)
    except Exception:
        return 64 * 1024 * 1024  # v7x per-TensorCore VMEM (smallest in the fleet)


def _umap_loss_kernel(x_ref, p_ref, out_ref, *, log_a, b, d, tile_n, n_valid,
                      apply_mask):
    """One grid step: tile_n (from, to) pairs -> partial CE sum.

    x_ref  : (tile_n, 2*d)          interleaved pairs, row i = [from_i | to_i]
    p_ref  : (1, tile_n//128, 128)  lane-dense target probabilities
    out_ref: (1, 1, 1)              per-core partial sum (resident accumulator)
    """
    step = pl.program_id(1)

    @pl.when(step == 0)
    def _init():
        out_ref[...] = jnp.zeros_like(out_ref)

    rows = tile_n // _LANES

    # TODO(synk): compute_distances is abstract in the base class; Euclidean
    # distance is the concrete choice implemented here.
    x = x_ref[...].astype(jnp.float32)                     # (tile_n, 2d)
    diff = x[:, :d] - x[:, d:2 * d]                        # (tile_n, d)
    d2 = jnp.sum(diff * diff, axis=-1, keepdims=True)      # (tile_n, 1)
    d2 = d2.reshape(rows, _LANES)                          # lane-dense repack

    # q = 1/(1 + a*dist^(2b)) = 1/(1 + a*d2^b) = sigmoid(-t), t = log(a)+b*log(d2)
    t = log_a + b * jnp.log(d2)
    sp = jnp.maximum(t, 0.0) + jnp.log1p(jnp.exp(-jnp.abs(t)))   # softplus(t)
    log_lo = math.log(_EPS)
    log_hi = math.log(1.0 - _EPS)
    log_q = jnp.clip(-sp, log_lo, log_hi)        # == log(clip(q,   eps, 1-eps))
    log_1mq = jnp.clip(t - sp, log_lo, log_hi)   # == log(1 - clip(q, eps, 1-eps))

    p = jnp.clip(p_ref[0].astype(jnp.float32), _EPS, 1.0 - _EPS)  # (rows, 128)
    ce = p * (jnp.log(p) - log_q) + (1.0 - p) * (jnp.log(1.0 - p) - log_1mq)

    if apply_mask:  # static flag: only emitted when N was padded to the grid
        core = pl.program_id(0)
        base = (core * pl.num_programs(1) + step) * tile_n
        pair_idx = (base
                    + jax.lax.broadcasted_iota(jnp.int32, (rows, _LANES), 0) * _LANES
                    + jax.lax.broadcasted_iota(jnp.int32, (rows, _LANES), 1))
        ce = jnp.where(pair_idx < n_valid, ce, 0.0)

    out_ref[...] = out_ref[...] + jnp.sum(ce)


def umap_loss(output, target_prob, a=UMAP_A, b=UMAP_B, tile_n=None):
    """output: (2N, D) float32/bfloat16, target_prob: (N,) -> scalar f32 loss."""
    two_n, d = output.shape
    if two_n % 2 != 0:
        raise ValueError("output must have an even number of rows (from/to pairs)")
    n = two_n // 2
    target_prob = jnp.reshape(target_prob, (n,)).astype(jnp.float32)

    # Keep bf16 embeddings bf16 in HBM (kernel casts per tile); otherwise f32.
    if output.dtype not in (jnp.bfloat16, jnp.float32):
        output = output.astype(jnp.float32)
    x_item = output.dtype.itemsize

    # --- generation-aware tile size (double-buffered blocks must fit VMEM) ---
    vmem_cap = _vmem_capacity_bytes()
    if tile_n is None:
        per_row = _round_up(2 * d, _LANES) * x_item + 4   # lane-padded x row + p elem
        cap_rows = (vmem_cap // 4) // (2 * per_row)       # /4 headroom, x2 pipeline bufs
        tile_n = max(_LANES, min(2048, (cap_rows // _LANES) * _LANES))
    else:
        tile_n = max(_LANES, _round_up(tile_n, _LANES))
    tile_n = min(tile_n, _round_up(n, _LANES))

    steps = _cdiv(n, tile_n)
    splits = 2 if steps >= 2 else 1          # 2 partial sums -> both TCs on v7x
    steps_per_split = _cdiv(steps, splits)
    n_pad = splits * steps_per_split * tile_n
    rows = tile_n // _LANES

    # --- host glue: free reshapes only (pad only when N is not tile-aligned) -
    x2 = output.reshape(n, 2 * d)            # row i = [from_i | to_i]; no HBM copy
    p1 = target_prob
    if n_pad != n:
        x2 = jnp.pad(x2, ((0, n_pad - n), (0, 0)))
        p1 = jnp.pad(p1, (0, n_pad - n))
    p3 = p1.reshape(splits * steps_per_split, rows, _LANES)

    # --- VMEM budget hint for the compiler -----------------------------------
    x_buf = tile_n * _round_up(2 * d, _LANES) * x_item
    p_buf = _round_up(rows, 8) * _LANES * 4
    need = 2 * (x_buf + p_buf) + (1 << 20)
    vmem_limit = int(min(vmem_cap - (4 << 20), max(2 * need, 16 << 20)))

    kernel = functools.partial(
        _umap_loss_kernel,
        log_a=float(math.log(a)), b=float(b), d=int(d), tile_n=int(tile_n),
        n_valid=int(n), apply_mask=bool(n_pad != n))

    partial_sums = pl.pallas_call(
        kernel,
        grid=(splits, steps_per_split),
        in_specs=[
            pl.BlockSpec((tile_n, 2 * d),
                         lambda c, i: (c * steps_per_split + i, 0)),
            pl.BlockSpec((1, rows, _LANES),
                         lambda c, i: (c * steps_per_split + i, 0, 0)),
        ],
        out_specs=pl.BlockSpec((1, 1, 1), lambda c, i: (c, 0, 0)),
        out_shape=jax.ShapeDtypeStruct((splits, 1, 1), jnp.float32),
        compiler_params=pltpu.CompilerParams(
            dimension_semantics=("parallel", "arbitrary"),
            vmem_limit_bytes=vmem_limit),
    )(x2, p3)

    return jnp.sum(partial_sums) / n


def umap_loss_ref(output, target_prob, a=UMAP_A, b=UMAP_B):
    """Pure-JAX reference mirroring the PyTorch forward."""
    x_from = output[0::2].astype(jnp.float32)
    x_to = output[1::2].astype(jnp.float32)
    dist = jnp.sqrt(jnp.sum((x_from - x_to) ** 2, axis=-1))
    prob = 1.0 / (1.0 + a * dist ** (2.0 * b))
    p = jnp.clip(target_prob.astype(jnp.float32), _EPS, 1.0 - _EPS)
    q = jnp.clip(prob, _EPS, 1.0 - _EPS)
    ce = p * jnp.log(p / q) + (1.0 - p) * jnp.log((1.0 - p) / (1.0 - q))
    return jnp.mean(ce)


if __name__ == "__main__":
    key = jax.random.PRNGKey(0)
    k1, k2, k3, k4, k5, k6 = jax.random.split(key, 6)

    # Config 1: multi-tile, both grid axes + padding/masking exercised.
    N1, D1 = 500, 16
    out1 = jax.random.normal(k1, (2 * N1, D1), dtype=jnp.float32)
    tp1 = jax.random.uniform(k2, (N1,), dtype=jnp.float32)
    loss1 = umap_loss(out1, tp1, tile_n=128)
    jax.block_until_ready(loss1)
    ref1 = umap_loss_ref(out1, tp1)
    assert jnp.allclose(loss1, ref1, rtol=1e-4, atol=1e-5), (loss1, ref1)

    # Config 2: tiny UMAP-style embedding dim, auto tile size, single block.
    N2, D2 = 8, 4
    out2 = jax.random.normal(k3, (2 * N2, D2), dtype=jnp.float32)
    tp2 = jax.random.uniform(k4, (N2,), dtype=jnp.float32)
    loss2 = umap_loss(out2, tp2)
    jax.block_until_ready(loss2)
    ref2 = umap_loss_ref(out2, tp2)
    assert jnp.allclose(loss2, ref2, rtol=1e-4, atol=1e-5), (loss2, ref2)

    # Config 3: bf16 embeddings (stay bf16 in HBM, cast to f32 in-kernel).
    N3, D3 = 256, 32
    out3 = jax.random.normal(k5, (2 * N3, D3), dtype=jnp.bfloat16)
    tp3 = jax.random.uniform(k6, (N3,), dtype=jnp.float32)
    loss3 = umap_loss(out3, tp3)
    jax.block_until_ready(loss3)
    ref3 = umap_loss_ref(out3, tp3)
    assert jnp.allclose(loss3, ref3, rtol=1e-3, atol=1e-5), (loss3, ref3)

    print("KERNEL_OK")
</pallas_src>

<mosaic_0001>
module attributes {stable_mosaic.version = 11 : i64} {
  func.func @_umap_loss_kernel(%arg0: i32, %arg1: i32, %arg2: memref<128x32xf32, #tpu.memory_space<vmem>>, %arg3: memref<1x1x128xf32, #tpu.memory_space<vmem>>, %arg4: memref<1x1x1xf32, #tpu.memory_space<vmem>>) attributes {dimension_semantics = [#tpu.dimension_semantics<parallel>, #tpu.dimension_semantics<arbitrary>], iteration_bounds = array<i64: 2, 2>, scalar_prefetch = 0 : i64, scratch_operands = 0 : i64, tpu.core_type = #tpu.core_type<tc>, window_params = [{transform_indices = @transform_0, window_bounds = array<i64: 128, 32>}, {transform_indices = @transform_1, window_bounds = array<i64: 1, 1, 128>}, {transform_indices = @transform_2, window_bounds = array<i64: 1, 1, 1>}]} {
    %c0_i32 = arith.constant 0 : i32
    %0 = arith.cmpi eq, %arg1, %c0_i32 : i32
    %1 = arith.extui %0 : i1 to i32
    %c0_i32_0 = arith.constant 0 : i32
    %2 = arith.cmpi ne, %1, %c0_i32_0 : i32
    scf.if %2 {
      %cst_27 = arith.constant 0.000000e+00 : f32
      %74 = vector.broadcast %cst_27 : f32 to vector<1x1x1xf32>
      %c0_28 = arith.constant 0 : index
      %c0_29 = arith.constant 0 : index
      %c0_30 = arith.constant 0 : index
      %75 = vector.load %arg4[%c0_28, %c0_29, %c0_30] : memref<1x1x1xf32, #tpu.memory_space<vmem>>, vector<1x1x1xf32>
      tpu.vector_store %arg4[%c0_28, %c0_29, %c0_30], %74 {strides = array<i32>} : memref<1x1x1xf32, #tpu.memory_space<vmem>>, vector<1x1x1xf32>,
    } else {
    }
    %c0 = arith.constant 0 : index
    %c0_1 = arith.constant 0 : index
    %3 = vector.load %arg2[%c0, %c0_1] : memref<128x32xf32, #tpu.memory_space<vmem>>, vector<128x32xf32>
    %4 = vector.extract_strided_slice %3 {offsets = [0, 0], sizes = [128, 16], strides = [1, 1]} : vector<128x32xf32> to vector<128x16xf32>
    %5 = vector.extract_strided_slice %3 {offsets = [0, 16], sizes = [128, 16], strides = [1, 1]} : vector<128x32xf32> to vector<128x16xf32>
    %6 = arith.subf %4, %5 : vector<128x16xf32>
    %7 = arith.mulf %6, %6 : vector<128x16xf32>
    %cst = arith.constant dense<0.000000e+00> : vector<128xf32>
    %8 = vector.multi_reduction <add>, %7, %cst [1] : vector<128x16xf32> to vector<128xf32>
    %9 = vector.shape_cast %8 : vector<128xf32> to vector<128x1xf32>
    %10 = vector.shape_cast %9 : vector<128x1xf32> to vector<1x128xf32>
    %11 = math.log %10 : vector<1x128xf32>
    %cst_2 = arith.constant 0.791539728 : f32
    %12 = vector.broadcast %cst_2 : f32 to vector<1x128xf32>
    %13 = arith.mulf %12, %11 : vector<1x128xf32>
    %cst_3 = arith.constant 6.570480e-01 : f32
    %14 = vector.broadcast %cst_3 : f32 to vector<1x128xf32>
    %15 = arith.addf %14, %13 : vector<1x128xf32>
    %cst_4 = arith.constant 0.000000e+00 : f32
    %16 = vector.broadcast %cst_4 : f32 to vector<1x128xf32>
    %17 = arith.maximumf %15, %16 : vector<1x128xf32>
    %18 = math.absf %15 : vector<1x128xf32>
    %cst_5 = arith.constant 0.000000e+00 : f32
    %19 = vector.broadcast %cst_5 : f32 to vector<1x128xf32>
    %20 = arith.subf %19, %18 : vector<1x128xf32>
    %21 = math.exp %20 : vector<1x128xf32>
    %22 = math.log1p %21 : vector<1x128xf32>
    %23 = arith.addf %17, %22 : vector<1x128xf32>
    %cst_6 = arith.constant 0.000000e+00 : f32
    %24 = vector.broadcast %cst_6 : f32 to vector<1x128xf32>
    %25 = arith.subf %24, %23 : vector<1x128xf32>
    %cst_7 = arith.constant -9.21034049 : f32
    %cst_8 = arith.constant -1.000050e-04 : f32
    %26 = vector.broadcast %cst_7 : f32 to vector<1x128xf32>
    %27 = arith.maximumf %26, %25 : vector<1x128xf32>
    %28 = vector.broadcast %cst_8 : f32 to vector<1x128xf32>
    %29 = arith.minimumf %28, %27 : vector<1x128xf32>
    %30 = arith.subf %15, %23 : vector<1x128xf32>
    %cst_9 = arith.constant -9.21034049 : f32
    %cst_10 = arith.constant -1.000050e-04 : f32
    %31 = vector.broadcast %cst_9 : f32 to vector<1x128xf32>
    %32 = arith.maximumf %31, %30 : vector<1x128xf32>
    %33 = vector.broadcast %cst_10 : f32 to vector<1x128xf32>
    %34 = arith.minimumf %33, %32 : vector<1x128xf32>
    %c0_11 = arith.constant 0 : index
    %c0_12 = arith.constant 0 : index
    %c0_13 = arith.constant 0 : index
    %35 = vector.load %arg3[%c0_11, %c0_12, %c0_13] : memref<1x1x128xf32, #tpu.memory_space<vmem>>, vector<1x1x128xf32>
    %36 = vector.shape_cast %35 : vector<1x1x128xf32> to vector<1x128xf32>
    %cst_14 = arith.constant 9.99999974E-5 : f32
    %cst_15 = arith.constant 0.999899983 : f32
    %37 = vector.broadcast %cst_14 : f32 to vector<1x128xf32>
    %38 = arith.maximumf %37, %36 : vector<1x128xf32>
    %39 = vector.broadcast %cst_15 : f32 to vector<1x128xf32>
    %40 = arith.minimumf %39, %38 : vector<1x128xf32>
    %41 = math.log %40 : vector<1x128xf32>
    %42 = arith.subf %41, %29 : vector<1x128xf32>
    %43 = arith.mulf %40, %42 : vector<1x128xf32>
    %cst_16 = arith.constant 1.000000e+00 : f32
    %44 = vector.broadcast %cst_16 : f32 to vector<1x128xf32>
    %45 = arith.subf %44, %40 : vector<1x128xf32>
    %cst_17 = arith.constant 1.000000e+00 : f32
    %46 = vector.broadcast %cst_17 : f32 to vector<1x128xf32>
    %47 = arith.subf %46, %40 : vector<1x128xf32>
    %48 = math.log %47 : vector<1x128xf32>
    %49 = arith.subf %48, %34 : vector<1x128xf32>
    %50 = arith.mulf %45, %49 : vector<1x128xf32>
    %51 = arith.addf %43, %50 : vector<1x128xf32>
    %c2_i32 = arith.constant 2 : i32
    %52 = arith.muli %arg0, %c2_i32 : i32
    %53 = arith.addi %52, %arg1 : i32
    %c128_i32 = arith.constant 128 : i32
    %54 = arith.muli %53, %c128_i32 : i32
    %55 = tpu.iota {dimensions = array<i32: 0>} : vector<1x128xi32>
    %c128_i32_18 = arith.constant 128 : i32
    %56 = vector.broadcast %c128_i32_18 : i32 to vector<1x128xi32>
    %57 = arith.muli %55, %56 : vector<1x128xi32>
    %58 = vector.broadcast %54 : i32 to vector<1x128xi32>
    %59 = arith.addi %58, %57 : vector<1x128xi32>
    %60 = tpu.iota {dimensions = array<i32: 1>} : vector<1x128xi32>
    %61 = arith.addi %59, %60 : vector<1x128xi32>
    %c500_i32 = arith.constant 500 : i32
    %62 = vector.broadcast %c500_i32 : i32 to vector<1x128xi32>
    %63 = arith.cmpi slt, %61, %62 : vector<1x128xi32>
    %cst_19 = arith.constant 0.000000e+00 : f32
    %64 = vector.broadcast %cst_19 : f32 to vector<1x128xf32>
    %65 = arith.select %63, %51, %64 : vector<1x128xi1>, vector<1x128xf32>
    %c0_20 = arith.constant 0 : index
    %c0_21 = arith.constant 0 : index
    %c0_22 = arith.constant 0 : index
    %66 = vector.load %arg4[%c0_20, %c0_21, %c0_22] : memref<1x1x1xf32, #tpu.memory_space<vmem>>, vector<1x1x1xf32>
    %67 = vector.shape_cast %65 : vector<1x128xf32> to vector<1x1x128xf32>
    %cst_23 = arith.constant dense<0.000000e+00> : vector<1xf32>
    %68 = vector.multi_reduction <add>, %67, %cst_23 [1, 2] : vector<1x1x128xf32> to vector<1xf32>
    %69 = vector.shape_cast %68 : vector<1xf32> to vector<1x1x1xf32>
    %70 = vector.extract %69[0, 0, 0] : f32 from vector<1x1x1xf32>
    %71 = vector.broadcast %70 : f32 to vector<1x1x1xf32>
    %72 = arith.addf %66, %71 : vector<1x1x1xf32>
    %c0_24 = arith.constant 0 : index
    %c0_25 = arith.constant 0 : index
    %c0_26 = arith.constant 0 : index
    %73 = vector.load %arg4[%c0_24, %c0_25, %c0_26] : memref<1x1x1xf32, #tpu.memory_space<vmem>>, vector<1x1x1xf32>
    tpu.vector_store %arg4[%c0_24, %c0_25, %c0_26], %72 {strides = array<i32>} : memref<1x1x1xf32, #tpu.memory_space<vmem>>, vector<1x1x1xf32>,
    return
  }
  func.func @transform_0(%arg0: i32, %arg1: i32) -> (i32, i32) {
    %c2_i32 = arith.constant 2 : i32
    %0 = arith.muli %arg0, %c2_i32 : i32
    %1 = arith.addi %0, %arg1 : i32
    %c0_i32 = arith.constant 0 : i32
    %c0_i32_0 = arith.constant 0 : i32
    return %1, %c0_i32 : i32, i32
  }
  func.func @transform_1(%arg0: i32, %arg1: i32) -> (i32, i32, i32) {
    %c2_i32 = arith.constant 2 : i32
    %0 = arith.muli %arg0, %c2_i32 : i32
    %1 = arith.addi %0, %arg1 : i32
    %c0_i32 = arith.constant 0 : i32
    %c0_i32_0 = arith.constant 0 : i32
    %c0_i32_1 = arith.constant 0 : i32
    return %1, %c0_i32, %c0_i32_0 : i32, i32, i32
  }
  func.func @transform_2(%arg0: i32, %arg1: i32) -> (i32, i32, i32) {
    %c0_i32 = arith.constant 0 : i32
    %c0_i32_0 = arith.constant 0 : i32
    %c0_i32_1 = arith.constant 0 : i32
    return %arg0, %c0_i32, %c0_i32_0 : i32, i32, i32
  }
}

</mosaic_0001>

<bundles_post_ra>
// kernel: tpu_custom_call.1
= control target key start
LH: loop header
LB: loop body
LE: loop exit
PB: predicated region body
PF: predicated region fallthrough
CT: control target
= control target key end

     0   :  { %s1876_s9 = smov 0   ;;  %s1878_s10 = smov 0   ;;  %s2363_s0 = inlined_call_operand.vmem [shape: f32[512,32], index: 0, kind: input, shape index: {}]   ;;  %s2364_s1 = inlined_call_operand.vmem [shape: f32[4,1,128], index: 1, kind: input, shape index: {}]   ;;  %s2365_s2 = inlined_call_operand.vmem [shape: f32[2,1,1], index: 2, kind: output, shape index: {}]  }
   0x1   :  { %s1880_s11 = smov 0   ;;  %s1882_s12 = smov 0  }
   0x2   :  { %s1884_s13 = smov 0  }
   0x3 LB: > { %s21_s14 = sadd.s32 1, %s1848_s11  ;;  %s24_s15 = sadd.s32 1, %s1852_s12  ;;  %s1856_s13 = sphi %s1884_s13, %s12_s13   ;;  %s1852_s12 = sphi %s1882_s12, %s2381_s12   ;;  %s1848_s11 = sphi %s1880_s11, %s2380_s11   ;;  %s1844_s10 = sphi %s1878_s10, %s2379_s10   ;;  %s1840_s9 = sphi %s1876_s9, %s2378_s9  }
   0x4   : > { %p22_p0 = scmp.ge.s32.totalorder %s21_s14, 2  ;;  %p1660_p1 = scmp.ge.s32.totalorder %s1856_s13, 1 }
   0x5   : > { %p149_p2 = scmp.lt.s32.totalorder %s1856_s13, 5 }
   0x6   : > { %s2383_s14 = smov (%p22_p0, %s21_s14), 0  ;;  %s2385_s15 = smov (!%p22_p0, %s24_s15), %s1852_s12 }
   0x7   : > { %p150_p3 = pnand %p1660_p1, %p149_p2  ;;  %p26_p4 = scmp.ge.s32.totalorder %s2385_s15, 2 }
   0x8   : > { %s1661_s16 = sshll.u32 (!%p150_p3), %s1844_s10, 1  ;;  %p193_p7 = scmp.lt.s32.totalorder (!%p150_p3), %s1844_s10, 1 }
   0x9   : > { %s2387_s15 = smov (%p26_p4, %s2385_s15), 0  ;;  %153 = sbr.rel (%p150_p3) target bundleno = 1115 (0x45b), region = 28 }
   0xa   : > { %s1909_s17 = sadd.s32 (!%p150_p3), %s1840_s9, %s1661_s16  ;;  %p1665_p8 = scmp.ne.s32.totalorder (!%p150_p3), %s1840_s9, 0 }
   0xb   : > { %s1662_s18 = sshll.u32 (!%p150_p3), %s1909_s17, 4  ;;  %p188_p5 = scmp.lt.s32.totalorder (!%p150_p3), %s1909_s17, 3 }
   0xc   : > { %p179_p6 = scmp.lt.s32.totalorder (!%p150_p3), %s1662_s18, 63 }
   0xe   : > { %s1914_s19 = scalar_select %p188_p5, %s1909_s17, 3 }
   0xf   : > { %s2389_s18 = smov (!%p179_p6, %s1662_s18), 63  ;;  %s2391_s10 = smov (!%p193_p7, %s1844_s10), 1 }
  0x10   : > { %s190_s22 = scalar_lea.vmem %s2364_s1, %s1914_s19  ;;  %s1663_s23 = sshll.u32 %s2389_s18, 3 }
  0x11   : > { %s1923_s26 = scalar_lea.vmem %s2363_s0, %s1663_s23  ;;  %s1928_s29 = scalar_lea.vmem %s2365_s2, %s2391_s10 }
  0x12   : > { %199 = sbr.rel (%p1665_p8) target bundleno = 25 (0x19), region = 32 }
  0x17   : > { %vm200_vm0 = vcmask 0   ;;  %v1858_v0 = vmov 0.0  }
  0x18   : > { %201 = vst.msk [vmem:[%s1928_s29] sm:$0x1] %vm200_vm0, %v1858_v0 }
  0x19 PF: > { %v204_v1 = vld [vmem:[%s1923_s26 + $0x10] sm:$0xff]  ;;  %v202_v2 = vld [vmem:[%s1923_s26] sm:$0xff]  ;;  %s1859_s30 = smov 112   ;;  %v203_v4 = vld [vmem:[%s1923_s26 + $0x8] sm:$0xff]  ;;  %vm314_vm1 = vcmask 130048   ;;  %s1667_s5 = sshll.u32 %s1909_s17, 7 }
  0x1a   : > { %238 = vrot.lane.b32.xlu1 %v204_v1, %s1859_s30  ;;  %234 = vrot.lane.b32.xlu0 %v202_v2, %s1859_s30  ;;  %v206_v3 = vld [vmem:[%s1923_s26 + $0x20] sm:$0xff]  ;;  %v205_v5 = vld [vmem:[%s1923_s26 + $0x18] sm:$0xff] }
  0x1b   : > { %242 = vrot.lane.b32.xlu2 %v206_v3, %s1859_s30  ;;  %v207_v6 = vld [vmem:[%s1923_s26 + $0x28] sm:$0xff]  ;;  %v208_v7 = vld [vmem:[%s1923_s26 + $0x30] sm:$0xff]  ;;  %v1947_v9 = vld [vmem:[%s1923_s26 + $0x40] sm:$0xff] }
  0x1c   : > { %v211_v8 = vld [vmem:[%s1923_s26 + $0x48] sm:$0xff]  ;;  %v209_v10 = vld [vmem:[%s1923_s26 + $0x38] sm:$0xff]  ;;  %v212_v11 = vld [vmem:[%s1923_s26 + $0x50] sm:$0xff] }
  0x1d   : > { %v1964_v37 = vld [vmem:[%s1923_s26 + $0x58] sm:$0xff]  ;;  %v1969_v38 = vld [vmem:[%s1923_s26 + $0x70] sm:$0xff]  ;;  %v1972_v39 = vld [vmem:[%s1923_s26 + $0x60] sm:$0xff] }
  0x1e   : > { %v1979_v40 = vld [vmem:[%s1923_s26 + $0x68] sm:$0xff]  ;;  %v1990_v60 = vld [vmem:[%s1923_s26 + $0x78] sm:$0xff] }
  0x22   : > { %236 = vrot.lane.b32.xlu0 %v203_v4, %s1859_s30  ;;  %240 = vrot.lane.b32.xlu1 %v205_v5, %s1859_s30 }
  0x23   : > { %244 = vrot.lane.b32.xlu2 %v207_v6, %s1859_s30 }
  0x2a   : > { %246 = vrot.lane.b32.xlu1 %v208_v7, %s1859_s30  ;;  %252 = vrot.lane.b32.xlu0 %v211_v8, %s1859_s30 }
  0x2b   : > { %250 = vrot.lane.b32.xlu2 %v1947_v9, %s1859_s30 }
  0x32   : > { %248 = vrot.lane.b32.xlu1 %v209_v10, %s1859_s30 }
  0x33   : > { %254 = vrot.lane.b32.xlu2 %v212_v11, %s1859_s30 }
  0x75   : > { %v243_v12 = vpop.permute.xlu2 %242 }
  0x76   : > { %v286_v19 = vsub.f32 %v206_v3, %v243_v12 }
  0x78   : > { %v302_v22 = vmul.f32 %v286_v19, %v286_v19 }
  0x7a   : > { %v327_v28 = vsel %vm314_vm1, %v302_v22, 0.0 }
  0x7d   : > { %v245_v23 = vpop.permute.xlu2 %244 }
  0x7e   : > { %v287_v29 = vsub.f32 %v207_v6, %v245_v23 }
  0x80   : > { %v303_v31 = vmul.f32 %v287_v29, %v287_v29 }
  0x82   : > { %v330_v34 = vsel %vm314_vm1, %v303_v31, 0.0 }
  0x85   : > { %v251_v44 = vpop.permute.xlu2 %250 }
  0x86   : > { %v290_v57 = vsub.f32 %v1947_v9, %v251_v44 }
  0x88   : > { %v306_v58 = vmul.f32 %v290_v57, %v290_v57 }
  0x8a   : > { %v339_v59 = vsel %vm314_vm1, %v306_v58, 0.0 }
  0x8c   : > { %v239_v13 = vpop.permute.xlu1 %238  ;;  %v235_v14 = vpop.permute.xlu0 %234 }
  0x8d   : > { %v284_v15 = vsub.f32 %v204_v1, %v239_v13  ;;  %v282_v16 = vsub.f32 %v202_v2, %v235_v14  ;;  %v255_v51 = vpop.permute.xlu2 %254 }
  0x8e   : > { %v292_v52 = vsub.f32 %v212_v11, %v255_v51 }
  0x8f   : > { %v300_v17 = vmul.f32 %v284_v15, %v284_v15  ;;  %v298_v18 = vmul.f32 %v282_v16, %v282_v16 }
  0x90   : > { %v308_v54 = vmul.f32 %v292_v52, %v292_v52 }
  0x91   : > { %v321_v20 = vsel %vm314_vm1, %v300_v17, 0.0  ;;  %v315_v21 = vsel %vm314_vm1, %v298_v18, 0.0 }
  0x92   : > { %322 = vadd.xlane.f32.xlu1 %v321_v20  ;;  %316 = vadd.xlane.f32.xlu0 %v315_v21  ;;  %v345_v56 = vsel %vm314_vm1, %v308_v54, 0.0 }
  0x94   : > { %v237_v24 = vpop.permute.xlu0 %236  ;;  %v241_v25 = vpop.permute.xlu1 %240 }
  0x95   : > { %v283_v26 = vsub.f32 %v203_v4, %v237_v24  ;;  %v285_v41 = vsub.f32 %v205_v5, %v241_v25 }
  0x97   : > { %v299_v27 = vmul.f32 %v283_v26, %v283_v26  ;;  %v301_v43 = vmul.f32 %v285_v41, %v285_v41 }
  0x99   : > { %v318_v30 = vsel %vm314_vm1, %v299_v27, 0.0  ;;  %v324_v46 = vsel %vm314_vm1, %v301_v43, 0.0 }
  0x9a   : > { %328 = vadd.xlane.f32.xlu1 %v327_v28  ;;  %319 = vadd.xlane.f32.xlu2 %v318_v30 }
  0x9c   : > { %v247_v32 = vpop.permute.xlu1 %246  ;;  %v253_v48 = vpop.permute.xlu0 %252 }
  0x9d   : > { %v288_v33 = vsub.f32 %v208_v7, %v247_v32  ;;  %v291_v50 = vsub.f32 %v211_v8, %v253_v48 }
  0x9f   : > { %v304_v35 = vmul.f32 %v288_v33, %v288_v33  ;;  %v307_v53 = vmul.f32 %v291_v50, %v291_v50 }
  0xa1   : > { %v333_v36 = vsel %vm314_vm1, %v304_v35, 0.0  ;;  %v342_v55 = vsel %vm314_vm1, %v307_v53, 0.0 }
  0xa2   : > { %331 = vadd.xlane.f32.xlu1 %v330_v34  ;;  %334 = vadd.xlane.f32.xlu2 %v333_v36 }
  0xa4   : > { %v249_v42 = vpop.permute.xlu1 %248 }
  0xa5   : > { %v289_v45 = vsub.f32 %v209_v10, %v249_v42 }
  0xa6   : > { %256 = vrot.lane.b32.xlu0 %v1964_v37, %s1859_s30 }
  0xa7   : > { %v305_v47 = vmul.f32 %v289_v45, %v289_v45 }
  0xa9   : > { %v336_v49 = vsel %vm314_vm1, %v305_v47, 0.0 }
  0xba   : > { %262 = vrot.lane.b32.xlu2 %v1969_v38, %s1859_s30 }
  0xbb   : > { %258 = vrot.lane.b32.xlu1 %v1972_v39, %s1859_s30 }
  0xc3   : > { %260 = vrot.lane.b32.xlu1 %v1979_v40, %s1859_s30 }
  0xd0   : > { %325 = vadd.xlane.f32.xlu0 %v324_v46 }
  0xd8   : > { %337 = vadd.xlane.f32.xlu0 %v336_v49 }
  0xe0   : > { %343 = vadd.xlane.f32.xlu0 %v342_v55 }
  0xe3   : > { %346 = vadd.xlane.f32.xlu2 %v345_v56 }
  0xed   : > { %340 = vadd.xlane.f32.xlu1 %v339_v59 }
  0xf4   : > { %264 = vrot.lane.b32.xlu0 %v1990_v60, %s1859_s30 }
 0x105   : > { %v317_v61 = vpop.xlane.xlu0 %316  ;;  %v323_v62 = vpop.xlane.xlu1 %322 }
 0x106   : > { %1718 = vlog2.f32 %v317_v61 }
 0x107   : > { %1720 = vlog2.f32 %v323_v62 }
 0x10c   : > { %v1719_v63 = vpop.eup %1718 }
 0x10d   : > { %v1721_v0 = vpop.eup %1720  ;;  %v364_v1 = vmul.f32 0.6931472, %v1719_v63  ;;  %v320_v2 = vpop.xlane.xlu2 %319 }
 0x10e   : > { %v329_v3 = vpop.xlane.xlu1 %328  ;;  %v368_v4 = vmul.f32 0.6931472, %v1721_v0  ;;  %1722 = vlog2.f32 %v320_v2 }
 0x10f   : > { %v395_v5 = vmul.f32 0.7915397, %v364_v1  ;;  %1724 = vlog2.f32 %v329_v3 }
 0x110   : > { %v397_v6 = vmul.f32 0.7915397, %v368_v4 }
 0x111   : > { %v1994_v7 = vadd.f32 0.657048, %v395_v5 }
 0x112   : > { %v1996_v8 = vadd.f32 0.657048, %v397_v6 }
 0x113   : > { %v443_v9 = vand.u32 2147483647, %v1994_v7  ;;  %v427_v57 = vmax.f32 %v1994_v7, 0.0 }
 0x114   : > { %v1723_v10 = vpop.eup %1722  ;;  %v445_v11 = vand.u32 2147483647, %v1996_v8  ;;  %v429_v0 = vmax.f32 %v1996_v8, 0.0 }
 0x115   : > { %v1725_v12 = vpop.eup %1724  ;;  %v459_v13 = vsub.f32 0.0, %v443_v9  ;;  %v366_v14 = vmul.f32 0.6931472, %v1723_v10  ;;  %v335_v34 = vpop.xlane.xlu2 %334 }
 0x116   : > { %v332_v15 = vpop.xlane.xlu1 %331  ;;  %v461_v16 = vsub.f32 0.0, %v445_v11  ;;  %v372_v17 = vmul.f32 0.6931472, %v1725_v12 }
 0x117   : > { %1726 = vlog2.f32 %v332_v15  ;;  %v475_v18 = vmul.f32 1.442695, %v459_v13  ;;  %v396_v19 = vmul.f32 0.7915397, %v366_v14 }
 0x118   : > { %v479_v20 = vmul.f32 1.442695, %v461_v16  ;;  %v399_v21 = vmul.f32 0.7915397, %v372_v17  ;;  %v257_v22 = vpop.permute.xlu0 %256 }
 0x119   : > { %1728 = vpow2.f32 %v475_v18  ;;  %v2000_v23 = vadd.f32 0.657048, %v396_v19  ;;  %v293_v24 = vsub.f32 %v1964_v37, %v257_v22 }
 0x11a   : > { %1730 = vpow2.f32 %v479_v20  ;;  %v2003_v25 = vadd.f32 0.657048, %v399_v21 }
 0x11b   : > { %v444_v26 = vand.u32 2147483647, %v2000_v23  ;;  %v309_v27 = vmul.f32 %v293_v24, %v293_v24  ;;  %1732 = vlog2.f32 %v335_v34 }
 0x11c   : > { %v447_v29 = vand.u32 2147483647, %v2003_v25 }
 0x11d   : > { %v1727_v28 = vpop.eup %1726  ;;  %v460_v30 = vsub.f32 0.0, %v444_v26  ;;  %v348_v32 = vsel %vm314_vm1, %v309_v27, 0.0 }
 0x11e   : > { %v374_v31 = vmul.f32 0.6931472, %v1727_v28  ;;  %v463_v33 = vsub.f32 0.0, %v447_v29  ;;  %349 = vadd.xlane.f32.xlu0 %v348_v32 }
 0x11f   : > { %v1729_v35 = vpop.eup %1728  ;;  %v477_v36 = vmul.f32 1.442695, %v460_v30 }
 0x120   : > { %v400_v41 = vmul.f32 0.7915397, %v374_v31  ;;  %v1731_v37 = vpop.eup %1730  ;;  %v507_v42 = vadd.f32 1.0, %v1729_v35  ;;  %v510_v43 = vmul.f32 -0.5, %v1729_v35  ;;  %v483_v46 = vmul.f32 1.442695, %v463_v33 }
 0x121   : > { %v525_v44 = vadd.f32 1.0, %v1731_v37  ;;  %v528_v45 = vmul.f32 -0.5, %v1731_v37  ;;  %1734 = vpow2.f32 %v477_v36  ;;  %v531_v51 = vand.u32 2147483647, %v1731_v37  ;;  %v1733_v52 = vpop.eup %1732 }
 0x122   : > { %1736 = vlog2.f32 %v507_v42  ;;  %v2008_v47 = vadd.f32 0.657048, %v400_v41  ;;  %v511_v50 = vadd.f32 1.0, %v510_v43  ;;  %v513_v53 = vand.u32 2147483647, %v1729_v35 }
 0x123   : > { %1738 = vlog2.f32 %v525_v44  ;;  %v529_v48 = vadd.f32 1.0, %v528_v45  ;;  %vm532_vm2 = vcmp.lt.f32.partialorder %v531_v51, 0.0004427343  ;;  %v376_v2 = vmul.f32 0.6931472, %v1733_v52 }
 0x124   : > { %v448_v49 = vand.u32 2147483647, %v2008_v47  ;;  %1740 = vpow2.f32 %v483_v46  ;;  %v512_v63 = vmul.f32 %v1729_v35, %v511_v50  ;;  %vm514_vm3 = vcmp.lt.f32.partialorder %v513_v53, 0.0004427343 }
 0x125   : > { %v530_v58 = vmul.f32 %v1731_v37, %v529_v48  ;;  %v401_v14 = vmul.f32 0.7915397, %v376_v2  ;;  %v428_v44 = vmax.f32 %v2000_v23, 0.0 }
 0x126   : > { %v464_v55 = vsub.f32 0.0, %v448_v49 }
 0x127   : > { %v1735_v54 = vpop.eup %1734  ;;  %v2022_v26 = vadd.f32 0.657048, %v401_v14 }
 0x128   : > { %v1737_v56 = vpop.eup %1736  ;;  %v516_v59 = vadd.f32 1.0, %v1735_v54  ;;  %v485_v4 = vmul.f32 1.442695, %v464_v55  ;;  %v519_v11 = vmul.f32 -0.5, %v1735_v54  ;;  %v522_v20 = vand.u32 2147483647, %v1735_v54 }
 0x129   : > { %v1739_v61 = vpop.eup %1738  ;;  %v509_v62 = vmul.f32 0.6931472, %v1737_v56  ;;  %v449_v41 = vand.u32 2147483647, %v2022_v26 }
 0x12a   : > { %v527_v1 = vmul.f32 0.6931472, %v1739_v61  ;;  %v1741_v5 = vpop.eup %1740  ;;  %1742 = vlog2.f32 %v516_v59  ;;  %v520_v19 = vadd.f32 1.0, %v519_v11  ;;  %vm2026_vm4 = vcmp.lt.f32.partialorder %v522_v20, 0.0004427343 }
 0x12b   : > { %v515_v3 = vsel %vm514_vm3, %v512_v63, %v509_v62  ;;  %v543_v16 = vadd.f32 1.0, %v1741_v5  ;;  %1744 = vpow2.f32 %v485_v4  ;;  %v546_v24 = vmul.f32 -0.5, %v1741_v5 }
 0x12c   : > { %v2013_v6 = vadd.f32 %v515_v3, %v427_v57  ;;  %v533_v9 = vsel %vm532_vm2, %v530_v58, %v527_v1  ;;  %v521_v33 = vmul.f32 %v1735_v54, %v520_v19  ;;  %v549_v42 = vand.u32 2147483647, %v1741_v5 }
 0x12d   : > { %v2015_v10 = vadd.f32 %v533_v9, %v429_v0  ;;  %v259_v18 = vpop.permute.xlu1 %258  ;;  %1746 = vlog2.f32 %v543_v16  ;;  %v547_v36 = vadd.f32 1.0, %v546_v24  ;;  %v465_v52 = vsub.f32 0.0, %v449_v41 }
 0x12e   : > { %v667_v12 = vsub.f32 0.0, %v2013_v6  ;;  %v715_v13 = vsub.f32 %v1994_v7, %v2013_v6  ;;  %v294_v50 = vsub.f32 %v1972_v39, %v259_v18  ;;  %v431_v54 = vmax.f32 %v2003_v25, 0.0 }
 0x12f   : > { %v717_v15 = vsub.f32 %v1996_v8, %v2015_v10  ;;  %v548_v51 = vmul.f32 %v1741_v5, %v547_v36  ;;  %vm550_vm5 = vcmp.lt.f32.partialorder %v549_v42, 0.0004427343  ;;  %v487_v63 = vmul.f32 1.442695, %v465_v52 }
 0x130   : > { %v683_v17 = vmax.f32 %v667_v12, -9.2103405  ;;  %v1743_v21 = vpop.eup %1742  ;;  %v310_v58 = vmul.f32 %v294_v50, %v294_v50  ;;  %v1860_v12 = vmov 0   ;;  %vm1116_vm2 = vcmask 130112  }
 0x131   : > { %v2024_v30 = vpop.eup %1744  ;;  %v518_v32 = vmul.f32 0.6931472, %v1743_v21  ;;  %1715 = vset.pattern.permute.xlu2 %v1860_v12  ;;  %1716 = vset.pattern.permute.xlu1 %v1860_v12  ;;  %v263_v21 = vpop.permute.xlu2 %262  ;;  %vm1120_vm3 = vcmask 195712  }
 0x132   : > { %v699_v22 = vmin.f32 %v683_v17, -0.000100005  ;;  %v552_v45 = vadd.f32 1.0, %v2024_v30  ;;  %v555_v55 = vmul.f32 -0.5, %v2024_v30  ;;  %v351_v2 = vsel %vm314_vm1, %v310_v58, 0.0  ;;  %1717 = vset.pattern.permute.xlu0 %v1860_v12 }
 0x133   : > { %v1747_v46 = vpop.eup %1746  ;;  %v524_v49 = vsel %vm2026_vm4, %v521_v33, %v518_v32  ;;  %352 = vadd.xlane.f32.xlu1 %v351_v2  ;;  %v558_v5 = vand.u32 2147483647, %v2024_v30  ;;  %v296_v33 = vsub.f32 %v1969_v38, %v263_v21  ;;  %vm1124_vm4 = vcmask 261312  }
 0x134   : > { %v784_v27 = vperm.slane %v699_v22, 0  ;;  %v785_v28 = vperm.slane %v699_v22, 1  ;;  %v786_v29 = vperm.slane %v699_v22, 2  ;;  %v787_v31 = vperm.slane %v699_v22, 3 }
 0x135   : > { %v788_v35 = vperm.slane %v699_v22, 4  ;;  %v789_v37 = vperm.slane %v699_v22, 5  ;;  %v790_v43 = vperm.slane %v699_v22, 6  ;;  %v791_v48 = vperm.slane %v699_v22, 7  ;;  %v261_v53 = vpop.permute.xlu1 %260 }
 0x136   : > { %912 = vst [vmem:[#allocation1] ss:$9 sm:$0xff] %v784_v27  ;;  %v2038_v56 = vadd.f32 %v524_v49, %v428_v44  ;;  %v545_v57 = vmul.f32 0.6931472, %v1747_v46  ;;  %1748 = vlog2.f32 %v552_v45  ;;  %v295_v59 = vsub.f32 %v1979_v40, %v261_v53 }
 0x137   : > { %914 = vst [vmem:[#allocation1 + $0x1] ss:$9 sm:$0xff] %v785_v28  ;;  %v556_v1 = vadd.f32 1.0, %v555_v55  ;;  %1750 = vpow2.f32 %v487_v63  ;;  %vm2051_vm6 = vcmp.lt.f32.partialorder %v558_v5, 0.0004427343  ;;  %v312_v44 = vmul.f32 %v296_v33, %v296_v33 }
 0x138   : > { %916 = vst [vmem:[#allocation1 + $0x2] ss:$9 sm:$0xff] %v786_v29  ;;  %v668_v39 = vsub.f32 0.0, %v2038_v56  ;;  %v716_v61 = vsub.f32 %v2000_v23, %v2038_v56  ;;  %v551_v62 = vsel %vm550_vm5, %v548_v51, %v545_v57  ;;  %v311_v40 = vmul.f32 %v295_v59, %v295_v59 }
 0x139   : > { %918 = vst [vmem:[#allocation1 + $0x3] ss:$9 sm:$0xff] %v787_v31  ;;  %v2044_v0 = vadd.f32 %v551_v62, %v431_v54  ;;  %v557_v14 = vmul.f32 %v2024_v30, %v556_v1  ;;  %v432_v30 = vmax.f32 %v2008_v47, 0.0  ;;  %v669_v31 = vsub.f32 0.0, %v2015_v10 }
 0x13a   : > { %920 = vst [vmem:[#allocation1 + $0x4] ss:$9 sm:$0xff] %v788_v35  ;;  %v684_v3 = vmax.f32 %v668_v39, -9.2103405  ;;  %v354_v27 = vsel %vm314_vm1, %v311_v40, 0.0  ;;  %v357_v49 = vsel %vm314_vm1, %v312_v44, 0.0 }
 0x13b   : > { %922 = vst [vmem:[#allocation1 + $0x5] ss:$9 sm:$0xff] %v789_v37  ;;  %v719_v4 = vsub.f32 %v2003_v25, %v2044_v0  ;;  %355 = vadd.xlane.f32.xlu1 %v354_v27  ;;  %v685_v42 = vmax.f32 %v669_v31, -9.2103405  ;;  %v433_v5 = vmax.f32 %v2022_v26, 0.0  ;;  %vm1128_vm5 = vcmask 326912  }
 0x13c   : > { %924 = vst [vmem:[#allocation1 + $0x6] ss:$9 sm:$0xff] %v790_v43  ;;  %v1749_v9 = vpop.eup %1748  ;;  %v700_v11 = vmin.f32 %v684_v3, -0.000100005  ;;  %v732_v6 = vmax.f32 %v716_v61, -9.2103405 }
 0x13d   : > { %926 = vst [vmem:[#allocation1 + $0x7] ss:$9 sm:$0xff] %v791_v48  ;;  %v554_v20 = vmul.f32 0.6931472, %v1749_v9  ;;  %v1751_v34 = vpop.eup %1750  ;;  %v701_v48 = vmin.f32 %v685_v42, -0.000100005 }
 0x13e   : > { %v792_v17 = vperm.slane %v700_v11, 0  ;;  %v793_v18 = vperm.slane %v700_v11, 1  ;;  %v794_v19 = vperm.slane %v700_v11, 2  ;;  %v795_v22 = vperm.slane %v700_v11, 3 }
 0x13f   : > { %v796_v29 = vperm.slane %v700_v11, 4  ;;  %v797_v32 = vperm.slane %v700_v11, 5  ;;  %v798_v35 = vperm.slane %v700_v11, 6  ;;  %v560_v36 = vsel %vm2051_vm6, %v557_v14, %v554_v20 }
 0x140   : > { %v799_v41 = vperm.slane %v700_v11, 7  ;;  %v2061_v37 = vadd.f32 %v560_v36, %v432_v30  ;;  %v561_v43 = vadd.f32 1.0, %v1751_v34  ;;  %v564_v46 = vmul.f32 -0.5, %v1751_v34 }
 0x141   : > { %v800_v54 = vperm.slane %v701_v48, 0  ;;  %v567_v55 = vand.u32 2147483647, %v1751_v34  ;;  %v801_v57 = vperm.slane %v701_v48, 1  ;;  %v802_v39 = vperm.slane %v701_v48, 2 }
 0x142   : > { %v720_v45 = vsub.f32 %v2008_v47, %v2061_v37  ;;  %v565_v53 = vadd.f32 1.0, %v564_v46  ;;  %v803_v63 = vperm.slane %v701_v48, 3  ;;  %v804_v3 = vperm.slane %v701_v48, 4 }
 0x143   : > { %v326_v28 = vpop.xlane.xlu0 %325  ;;  %358 = vadd.xlane.f32.xlu1 %v357_v49  ;;  %vm568_vm7 = vcmp.lt.f32.partialorder %v567_v55, 0.0004427343  ;;  %v805_v40 = vperm.slane %v701_v48, 5  ;;  %v806_v9 = vperm.slane %v701_v48, 6  ;;  %vm1132_vm6 = vcmask 392512  }
 0x144   : > { %v927_v16 = vld [vmem:[#allocation1] sm:$0xff]  ;;  %1752 = vlog2.f32 %v326_v28  ;;  %v566_v1 = vmul.f32 %v1751_v34, %v565_v53 }
 0x145   : > { %1064 = vperm.xlu2 %1715, %v927_v16   ;;  %928 = vst [vmem:[#allocation1] ss:$9 sm:$0xff] %v792_v17  ;;  %1754 = vlog2.f32 %v561_v43  ;;  %v807_v16 = vperm.slane %v701_v48, 7 }
 0x146   : > { %929 = vst [vmem:[#allocation1 + $0x1] ss:$9 sm:$0xff] %v793_v18 }
 0x147   : > { %930 = vst [vmem:[#allocation1 + $0x2] ss:$9 sm:$0xff] %v794_v19 }
 0x148   : > { %931 = vst [vmem:[#allocation1 + $0x3] ss:$9 sm:$0xff] %v795_v22 }
 0x149   : > { %932 = vst [vmem:[#allocation1 + $0x4] ss:$9 sm:$0xff] %v796_v29 }
 0x14a   : > { %933 = vst [vmem:[#allocation1 + $0x5] ss:$9 sm:$0xff] %v797_v32  ;;  %v1753_v38 = vpop.eup %1752 }
 0x14b   : > { %934 = vst [vmem:[#allocation1 + $0x6] ss:$9 sm:$0xff] %v798_v35  ;;  %v370_v50 = vmul.f32 0.6931472, %v1753_v38  ;;  %v338_v51 = vpop.xlane.xlu0 %337  ;;  %v1755_v59 = vpop.eup %1754 }
 0x14c   : > { %935 = vst [vmem:[#allocation1 + $0x7] ss:$9 sm:$0xff] %v799_v41  ;;  %1756 = vlog2.f32 %v338_v51  ;;  %v563_v11 = vmul.f32 0.6931472, %v1755_v59 }
 0x14d   : > { %v398_v52 = vmul.f32 0.7915397, %v370_v50 }
 0x14e   : > { %v569_v17 = vsel %vm568_vm7, %v566_v1, %v563_v11  ;;  %vm1136_vm7 = vcmask 458112  }
 0x14f   : > { %v2068_v62 = vadd.f32 0.657048, %v398_v52  ;;  %v2072_v18 = vadd.f32 %v569_v17, %v433_v5 }
 0x151   : > { %v446_v12 = vand.u32 2147483647, %v2068_v62  ;;  %v721_v21 = vsub.f32 %v2022_v26, %v2072_v18  ;;  %v430_v52 = vmax.f32 %v2068_v62, 0.0 }
 0x152   : > { %v1757_v2 = vpop.eup %1756 }
 0x153   : > { %v2066_v58 = vld [vmem:[#allocation1] sm:$0xff]  ;;  %v378_v14 = vmul.f32 0.6931472, %v1757_v2  ;;  %v462_v19 = vsub.f32 0.0, %v446_v12  ;;  %v344_v27 = vpop.xlane.xlu0 %343 }
 0x154   : > { %937 = vst [vmem:[#allocation1] ss:$9 sm:$0xff] %v800_v54 }
 0x155   : > { %938 = vst [vmem:[#allocation1 + $0x1] ss:$9 sm:$0xff] %v801_v57  ;;  %v402_v20 = vmul.f32 0.7915397, %v378_v14  ;;  %v481_v22 = vmul.f32 1.442695, %v462_v19 }
 0x156   : > { %939 = vst [vmem:[#allocation1 + $0x2] ss:$9 sm:$0xff] %v802_v39 }
 0x157   : > { %940 = vst [vmem:[#allocation1 + $0x3] ss:$9 sm:$0xff] %v803_v63  ;;  %v2076_v24 = vadd.f32 0.657048, %v402_v20  ;;  %1758 = vpow2.f32 %v481_v22 }
 0x158   : > { %941 = vst [vmem:[#allocation1 + $0x4] ss:$9 sm:$0xff] %v804_v3  ;;  %1760 = vlog2.f32 %v344_v27 }
 0x159   : > { %942 = vst [vmem:[#allocation1 + $0x5] ss:$9 sm:$0xff] %v805_v40  ;;  %v450_v28 = vand.u32 2147483647, %v2076_v24 }
 0x15a   : > { %943 = vst [vmem:[#allocation1 + $0x6] ss:$9 sm:$0xff] %v806_v9 }
 0x15b   : > { %944 = vst [vmem:[#allocation1 + $0x7] ss:$9 sm:$0xff] %v807_v16  ;;  %v466_v29 = vsub.f32 0.0, %v450_v28 }
 0x15d   : > { %v1759_v30 = vpop.eup %1758  ;;  %v489_v33 = vmul.f32 1.442695, %v466_v29  ;;  %v671_v29 = vsub.f32 0.0, %v2044_v0  ;;  %v736_v0 = vmax.f32 %v720_v45, -9.2103405 }
 0x15e   : > { %v1761_v31 = vpop.eup %1760  ;;  %v534_v32 = vadd.f32 1.0, %v1759_v30  ;;  %v537_v34 = vmul.f32 -0.5, %v1759_v30  ;;  %v540_v43 = vand.u32 2147483647, %v1759_v30 }
 0x15f   : > { %v382_v35 = vmul.f32 0.6931472, %v1761_v31 }
 0x160   : > { %1762 = vlog2.f32 %v534_v32  ;;  %v538_v41 = vadd.f32 1.0, %v537_v34  ;;  %v341_v38 = vpop.xlane.xlu1 %340  ;;  %vm541_vm8 = vcmp.lt.f32.partialorder %v540_v43, 0.0004427343 }
 0x161   : > { %1764 = vpow2.f32 %v489_v33  ;;  %v404_v36 = vmul.f32 0.7915397, %v382_v35  ;;  %v434_v33 = vmax.f32 %v2076_v24, 0.0 }
 0x162   : > { %1766 = vlog2.f32 %v341_v38  ;;  %v539_v50 = vmul.f32 %v1759_v30, %v538_v41  ;;  %v2088_v22 = vld [vmem:[#allocation1] sm:$0xff]  ;;  %v687_v38 = vmax.f32 %v671_v29, -9.2103405 }
 0x163   : > { %v2079_v42 = vadd.f32 0.657048, %v404_v36 }
 0x165   : > { %v452_v44 = vand.u32 2147483647, %v2079_v42 }
 0x166   : > { %v1763_v46 = vpop.eup %1762 }
 0x167   : > { %v1765_v48 = vpop.eup %1764  ;;  %v536_v49 = vmul.f32 0.6931472, %v1763_v46  ;;  %v468_v51 = vsub.f32 0.0, %v452_v44 }
 0x168   : > { %v570_v53 = vadd.f32 1.0, %v1765_v48  ;;  %v1767_v59 = vpop.eup %1766  ;;  %v573_v1 = vmul.f32 -0.5, %v1765_v48  ;;  %v576_v12 = vand.u32 2147483647, %v1765_v48 }
 0x169   : > { %v542_v54 = vsel %vm541_vm8, %v539_v50, %v536_v49  ;;  %v493_v55 = vmul.f32 1.442695, %v468_v51  ;;  %v380_v2 = vmul.f32 0.6931472, %v1767_v59  ;;  %v265_v49 = vpop.permute.xlu0 %264  ;;  %v347_v51 = vpop.xlane.xlu2 %346  ;;  %vm1140_vm8 = vcmask 523712  }
 0x16a   : > { %v2083_v57 = vadd.f32 %v542_v54, %v430_v52  ;;  %1768 = vlog2.f32 %v570_v53  ;;  %v574_v11 = vadd.f32 1.0, %v573_v1  ;;  %vm577_vm9 = vcmp.lt.f32.partialorder %v576_v12, 0.0004427343 }
 0x16b   : > { %1770 = vpow2.f32 %v493_v55  ;;  %v403_v5 = vmul.f32 0.7915397, %v380_v2  ;;  %v297_v53 = vsub.f32 %v1990_v60, %v265_v49  ;;  %v703_v54 = vmin.f32 %v687_v38, -0.000100005 }
 0x16c   : > { %v670_v39 = vsub.f32 0.0, %v2083_v57  ;;  %v718_v63 = vsub.f32 %v2068_v62, %v2083_v57  ;;  %v575_v31 = vmul.f32 %v1765_v48, %v574_v11  ;;  %v672_v11 = vsub.f32 0.0, %v2061_v37 }
 0x16d   : > { %v2090_v28 = vadd.f32 0.657048, %v403_v5  ;;  %v313_v1 = vmul.f32 %v297_v53, %v297_v53  ;;  %v816_v2 = vperm.slane %v703_v54, 0  ;;  %v817_v5 = vperm.slane %v703_v54, 1 }
 0x16e   : > { %v686_v3 = vmax.f32 %v670_v39, -9.2103405  ;;  %v820_v29 = vperm.slane %v703_v54, 4  ;;  %v735_v62 = vmax.f32 %v719_v4, -9.2103405 }
 0x16f   : > { %v451_v44 = vand.u32 2147483647, %v2090_v28  ;;  %v752_v4 = vmin.f32 %v736_v0, -0.000100005  ;;  %v737_v37 = vmax.f32 %v721_v21, -9.2103405 }
 0x170   : > { %v1769_v40 = vpop.eup %1768  ;;  %v702_v9 = vmin.f32 %v686_v3, -0.000100005 }
 0x171   : > { %v572_v19 = vmul.f32 0.6931472, %v1769_v40  ;;  %v1771_v20 = vpop.eup %1770  ;;  %v467_v48 = vsub.f32 0.0, %v451_v44  ;;  %v818_v40 = vperm.slane %v703_v54, 2  ;;  %v1243_v47 = vperm.slane %v752_v4, 7 }
 0x172   : > { %v808_v14 = vperm.slane %v702_v9, 0  ;;  %v809_v16 = vperm.slane %v702_v9, 1  ;;  %v810_v17 = vperm.slane %v702_v9, 2  ;;  %v811_v27 = vperm.slane %v702_v9, 3 }
 0x173   : > { %v812_v30 = vperm.slane %v702_v9, 4  ;;  %v813_v32 = vperm.slane %v702_v9, 5  ;;  %v814_v34 = vperm.slane %v702_v9, 6  ;;  %v578_v35 = vsel %vm577_vm9, %v575_v31, %v572_v19 }
 0x174   : > { %946 = vst [vmem:[#allocation1] ss:$9 sm:$0xff] %v808_v14  ;;  %v588_v36 = vadd.f32 1.0, %v1771_v20  ;;  %v815_v41 = vperm.slane %v702_v9, 7  ;;  %v2094_v43 = vadd.f32 %v578_v35, %v434_v33  ;;  %v591_v50 = vmul.f32 -0.5, %v1771_v20 }
 0x175   : > { %947 = vst [vmem:[#allocation1 + $0x1] ss:$9 sm:$0xff] %v809_v16  ;;  %v491_v52 = vmul.f32 1.442695, %v467_v48  ;;  %v594_v39 = vand.u32 2147483647, %v1771_v20 }
 0x176   : > { %948 = vst [vmem:[#allocation1 + $0x2] ss:$9 sm:$0xff] %v810_v17  ;;  %v722_v46 = vsub.f32 %v2076_v24, %v2094_v43  ;;  %1772 = vlog2.f32 %v588_v36  ;;  %v592_v55 = vadd.f32 1.0, %v591_v50  ;;  %v819_v9 = vperm.slane %v703_v54, 3 }
 0x177   : > { %949 = vst [vmem:[#allocation1 + $0x3] ss:$9 sm:$0xff] %v811_v27  ;;  %1774 = vlog2.f32 %v347_v51  ;;  %v436_v19 = vmax.f32 %v2079_v42, 0.0  ;;  %vm595_vm10 = vcmp.lt.f32.partialorder %v594_v39, 0.0004427343  ;;  %v360_v27 = vsel %vm314_vm1, %v313_v1, 0.0 }
 0x178   : > { %950 = vst [vmem:[#allocation1 + $0x4] ss:$9 sm:$0xff] %v812_v30  ;;  %1776 = vpow2.f32 %v491_v52  ;;  %v593_v16 = vmul.f32 %v1771_v20, %v592_v55  ;;  %361 = vadd.xlane.f32.xlu1 %v360_v27  ;;  %v821_v33 = vperm.slane %v703_v54, 5  ;;  %v822_v35 = vperm.slane %v703_v54, 6 }
 0x179   : > { %951 = vst [vmem:[#allocation1 + $0x5] ss:$9 sm:$0xff] %v813_v32  ;;  %v823_v36 = vperm.slane %v703_v54, 7  ;;  %vm1144_vm9 = vcmask 589312   ;;  %v753_v45 = vmin.f32 %v737_v37, -0.000100005 }
 0x17a   : > { %952 = vst [vmem:[#allocation1 + $0x6] ss:$9 sm:$0xff] %v814_v34 }
 0x17b   : > { %953 = vst [vmem:[#allocation1 + $0x7] ss:$9 sm:$0xff] %v815_v41  ;;  %v688_v41 = vmax.f32 %v672_v11, -9.2103405  ;;  %v1251_v26 = vperm.slane %v753_v45, 7 }
 0x17c   : > { %v1773_v59 = vpop.eup %1772 }
 0x17d   : > { %v1775_v3 = vpop.eup %1774  ;;  %v590_v14 = vmul.f32 0.6931472, %v1773_v59  ;;  %v704_v50 = vmin.f32 %v688_v41, -0.000100005 }
 0x17e   : > { %v384_v60 = vmul.f32 0.6931472, %v1775_v3  ;;  %v1777_v17 = vpop.eup %1776 }
 0x17f   : > { %v596_v30 = vsel %vm595_vm10, %v593_v16, %v590_v14  ;;  %v579_v31 = vadd.f32 1.0, %v1777_v17  ;;  %v582_v38 = vmul.f32 -0.5, %v1777_v17  ;;  %v585_v52 = vand.u32 2147483647, %v1777_v17 }
 0x180   : > { %v405_v32 = vmul.f32 0.7915397, %v384_v60  ;;  %v2105_v34 = vadd.f32 %v596_v30, %v436_v19  ;;  %v824_v59 = vperm.slane %v704_v50, 0  ;;  %v825_v54 = vperm.slane %v704_v50, 1 }
 0x181   : > { %1778 = vlog2.f32 %v579_v31  ;;  %v583_v51 = vadd.f32 1.0, %v582_v38  ;;  %vm586_vm11 = vcmp.lt.f32.partialorder %v585_v52, 0.0004427343  ;;  %v826_v3 = vperm.slane %v704_v50, 2 }
 0x182   : > { %v2101_v12 = vld [vmem:[#allocation1] sm:$0xff]  ;;  %v2107_v20 = vadd.f32 0.657048, %v405_v32  ;;  %v724_v44 = vsub.f32 %v2079_v42, %v2105_v34  ;;  %v828_v11 = vperm.slane %v704_v50, 4  ;;  %v829_v16 = vperm.slane %v704_v50, 5 }
 0x183   : > { %955 = vst [vmem:[#allocation1] ss:$9 sm:$0xff] %v816_v2  ;;  %v584_v39 = vmul.f32 %v1777_v17, %v583_v51  ;;  %v435_v2 = vmax.f32 %v2090_v28, 0.0  ;;  %v830_v17 = vperm.slane %v704_v50, 6  ;;  %v831_v19 = vperm.slane %v704_v50, 7 }
 0x184   : > { %956 = vst [vmem:[#allocation1 + $0x1] ss:$9 sm:$0xff] %v817_v5  ;;  %v453_v48 = vand.u32 2147483647, %v2107_v20  ;;  %v674_v52 = vsub.f32 0.0, %v2094_v43  ;;  %vm1148_vm10 = vcmask 654912  }
 0x185   : > { %957 = vst [vmem:[#allocation1 + $0x2] ss:$9 sm:$0xff] %v818_v40  ;;  %v827_v40 = vperm.slane %v704_v50, 3 }
 0x186   : > { %958 = vst [vmem:[#allocation1 + $0x3] ss:$9 sm:$0xff] %v819_v9  ;;  %v469_v49 = vsub.f32 0.0, %v453_v48  ;;  %v673_v9 = vsub.f32 0.0, %v2072_v18  ;;  %v738_v18 = vmax.f32 %v722_v46, -9.2103405 }
 0x187   : > { %959 = vst [vmem:[#allocation1 + $0x4] ss:$9 sm:$0xff] %v820_v29  ;;  %v1779_v55 = vpop.eup %1778 }
 0x188   : > { %960 = vst [vmem:[#allocation1 + $0x5] ss:$9 sm:$0xff] %v821_v33  ;;  %v495_v53 = vmul.f32 1.442695, %v469_v49  ;;  %v581_v5 = vmul.f32 0.6931472, %v1779_v55 }
 0x189   : > { %961 = vst [vmem:[#allocation1 + $0x6] ss:$9 sm:$0xff] %v822_v35  ;;  %v689_v27 = vmax.f32 %v673_v9, -9.2103405  ;;  %v754_v21 = vmin.f32 %v738_v18, -0.000100005 }
 0x18a   : > { %962 = vst [vmem:[#allocation1 + $0x7] ss:$9 sm:$0xff] %v823_v36  ;;  %1780 = vpow2.f32 %v495_v53  ;;  %v587_v14 = vsel %vm586_vm11, %v584_v39, %v581_v5  ;;  %vm1152_vm11 = vcmask 720512  }
 0x18b   : > { %v2116_v60 = vadd.f32 %v587_v14, %v435_v2  ;;  %v705_v32 = vmin.f32 %v689_v27, -0.000100005  ;;  %v1258_v0 = vperm.slane %v754_v21, 6  ;;  %v1259_v24 = vperm.slane %v754_v21, 7 }
 0x18d   : > { %v723_v29 = vsub.f32 %v2090_v28, %v2116_v60  ;;  %v832_v35 = vperm.slane %v705_v32, 0  ;;  %v833_v38 = vperm.slane %v705_v32, 1  ;;  %v834_v49 = vperm.slane %v705_v32, 2 }
 0x18e   : > { %v835_v51 = vperm.slane %v705_v32, 3  ;;  %v836_v55 = vperm.slane %v705_v32, 4  ;;  %v839_v2 = vperm.slane %v705_v32, 7  ;;  %v740_v28 = vmax.f32 %v724_v44, -9.2103405 }
 0x18f   : > { %v739_v43 = vmax.f32 %v723_v29, -9.2103405 }
 0x190   : > { %v1781_v30 = vpop.eup %1780  ;;  %v756_v29 = vmin.f32 %v740_v28, -0.000100005 }
 0x191   : > { %v2112_v1 = vld [vmem:[#allocation1] sm:$0xff]  ;;  %v597_v31 = vadd.f32 1.0, %v1781_v30  ;;  %v600_v33 = vmul.f32 -0.5, %v1781_v30  ;;  %1067 = vperm.xlu1 %1716, %v2066_v58   ;;  %v603_v41 = vand.u32 2147483647, %v1781_v30  ;;  %v837_v58 = vperm.slane %v705_v32, 5 }
 0x192   : > { %964 = vst [vmem:[#allocation1] ss:$9 sm:$0xff] %v824_v59  ;;  %v437_v59 = vmax.f32 %v2107_v20, 0.0  ;;  %v755_v46 = vmin.f32 %v739_v43, -0.000100005  ;;  %v1275_v42 = vperm.slane %v756_v29, 7 }
 0x193   : > { %965 = vst [vmem:[#allocation1 + $0x1] ss:$9 sm:$0xff] %v825_v54  ;;  %1782 = vlog2.f32 %v597_v31  ;;  %v601_v36 = vadd.f32 1.0, %v600_v33  ;;  %vm604_vm12 = vcmp.lt.f32.partialorder %v603_v41, 0.0004427343  ;;  %v838_v54 = vperm.slane %v705_v32, 6 }
 0x194   : > { %966 = vst [vmem:[#allocation1 + $0x2] ss:$9 sm:$0xff] %v826_v3  ;;  %v690_v3 = vmax.f32 %v674_v52, -9.2103405  ;;  %v675_v31 = vsub.f32 0.0, %v2116_v60  ;;  %v1267_v60 = vperm.slane %v755_v46, 7 }
 0x195   : > { %967 = vst [vmem:[#allocation1 + $0x3] ss:$9 sm:$0xff] %v827_v40  ;;  %v602_v53 = vmul.f32 %v1781_v30, %v601_v36 }
 0x196   : > { %968 = vst [vmem:[#allocation1 + $0x4] ss:$9 sm:$0xff] %v828_v11  ;;  %v350_v11 = vpop.xlane.xlu0 %349  ;;  %v706_v14 = vmin.f32 %v690_v3, -0.000100005 }
 0x197   : > { %969 = vst [vmem:[#allocation1 + $0x5] ss:$9 sm:$0xff] %v829_v16  ;;  %1784 = vlog2.f32 %v350_v11 }
 0x198   : > { %970 = vst [vmem:[#allocation1 + $0x6] ss:$9 sm:$0xff] %v830_v17  ;;  %v840_v16 = vperm.slane %v706_v14, 0  ;;  %v842_v30 = vperm.slane %v706_v14, 2  ;;  %v844_v32 = vperm.slane %v706_v14, 4  ;;  %v845_v33 = vperm.slane %v706_v14, 5 }
 0x199   : > { %971 = vst [vmem:[#allocation1 + $0x7] ss:$9 sm:$0xff] %v831_v19  ;;  %v1783_v50 = vpop.eup %1782  ;;  %1070 = vperm.xlu1 %1716, %v2088_v22   ;;  %v841_v19 = vperm.slane %v706_v14, 1  ;;  %v843_v22 = vperm.slane %v706_v14, 3  ;;  %v846_v36 = vperm.slane %v706_v14, 6  ;;  %v847_v41 = vperm.slane %v706_v14, 7 }
 0x19a   : > { %v599_v39 = vmul.f32 0.6931472, %v1783_v50 }
 0x19c   : > { %v605_v5 = vsel %vm604_vm12, %v602_v53, %v599_v39  ;;  %vm1156_vm12 = vcmask 786112  }
 0x19d   : > { %v2124_v40 = vadd.f32 %v605_v5, %v437_v59  ;;  %v1785_v27 = vpop.eup %1784 }
 0x1a0   : > { %v972_v48 = vld [vmem:[#allocation1] sm:$0xff] }
 0x1a1   : > { %973 = vst [vmem:[#allocation1] ss:$9 sm:$0xff] %v832_v35  ;;  %1079 = vperm.xlu0 %1717, %v972_v48   ;;  %1073 = vperm.xlu1 %1716, %v2101_v12   ;;  %v386_v35 = vmul.f32 0.6931472, %v1785_v27  ;;  %v691_v12 = vmax.f32 %v675_v31, -9.2103405 }
 0x1a2   : > { %974 = vst [vmem:[#allocation1 + $0x1] ss:$9 sm:$0xff] %v833_v38 }
 0x1a3   : > { %975 = vst [vmem:[#allocation1 + $0x2] ss:$9 sm:$0xff] %v834_v49  ;;  %v406_v38 = vmul.f32 0.7915397, %v386_v35  ;;  %v707_v49 = vmin.f32 %v691_v12, -0.000100005 }
 0x1a4   : > { %976 = vst [vmem:[#allocation1 + $0x3] ss:$9 sm:$0xff] %v835_v51 }
 0x1a5   : > { %977 = vst [vmem:[#allocation1 + $0x4] ss:$9 sm:$0xff] %v836_v55  ;;  %v2131_v48 = vadd.f32 0.657048, %v406_v38  ;;  %v848_v52 = vperm.slane %v707_v49, 0  ;;  %v849_v59 = vperm.slane %v707_v49, 1 }
 0x1a6   : > { %978 = vst [vmem:[#allocation1 + $0x5] ss:$9 sm:$0xff] %v837_v58  ;;  %v353_v58 = vpop.xlane.xlu1 %352  ;;  %v850_v39 = vperm.slane %v707_v49, 2  ;;  %v853_v3 = vperm.slane %v707_v49, 5  ;;  %v854_v5 = vperm.slane %v707_v49, 6  ;;  %v855_v14 = vperm.slane %v707_v49, 7 }
 0x1a7   : > { %979 = vst [vmem:[#allocation1 + $0x6] ss:$9 sm:$0xff] %v838_v54  ;;  %v454_v50 = vand.u32 2147483647, %v2131_v48  ;;  %v676_v54 = vsub.f32 0.0, %v2105_v34  ;;  %v2371_v34 = vsub.f32 %v2107_v20, %v2124_v40 }
 0x1a8   : > { %980 = vst [vmem:[#allocation1 + $0x7] ss:$9 sm:$0xff] %v839_v2  ;;  %v851_v2 = vperm.slane %v707_v49, 3 }
 0x1a9   : > { %1076 = vperm.xlu1 %1716, %v2112_v1   ;;  %v470_v51 = vsub.f32 0.0, %v454_v50  ;;  %v852_v1 = vperm.slane %v707_v49, 4  ;;  %v692_v11 = vmax.f32 %v676_v54, -9.2103405  ;;  %v741_v44 = vmax.f32 %v2371_v34, -9.2103405 }
 0x1ab   : > { %v497_v53 = vmul.f32 1.442695, %v470_v51  ;;  %v708_v31 = vmin.f32 %v692_v11, -0.000100005 }
 0x1ad   : > { %1786 = vpow2.f32 %v497_v53  ;;  %v858_v49 = vperm.slane %v708_v31, 2  ;;  %v859_v50 = vperm.slane %v708_v31, 3  ;;  %v860_v51 = vperm.slane %v708_v31, 4 }
 0x1ae   : > { %1788 = vlog2.f32 %v353_v58  ;;  %v356_v27 = vpop.xlane.xlu1 %355  ;;  %v438_v58 = vmax.f32 %v2131_v48, 0.0  ;;  %v861_v11 = vperm.slane %v708_v31, 5 }
 0x1af   : > { %v981_v17 = vld [vmem:[#allocation1] sm:$0xff]  ;;  %1790 = vlog2.f32 %v356_v27 }
 0x1b0   : > { %982 = vst [vmem:[#allocation1] ss:$9 sm:$0xff] %v840_v16  ;;  %1082 = vperm.xlu2 %1715, %v981_v17  }
 0x1b1   : > { %983 = vst [vmem:[#allocation1 + $0x1] ss:$9 sm:$0xff] %v841_v19 }
 0x1b2   : > { %984 = vst [vmem:[#allocation1 + $0x2] ss:$9 sm:$0xff] %v842_v30 }
 0x1b3   : > { %985 = vst [vmem:[#allocation1 + $0x3] ss:$9 sm:$0xff] %v843_v22  ;;  %v1787_v16 = vpop.eup %1786 }
 0x1b4   : > { %986 = vst [vmem:[#allocation1 + $0x4] ss:$9 sm:$0xff] %v844_v32  ;;  %v1789_v17 = vpop.eup %1788  ;;  %v606_v19 = vadd.f32 1.0, %v1787_v16  ;;  %v609_v30 = vmul.f32 -0.5, %v1787_v16  ;;  %v612_v12 = vand.u32 2147483647, %v1787_v16 }
 0x1b5   : > { %987 = vst [vmem:[#allocation1 + $0x5] ss:$9 sm:$0xff] %v845_v33  ;;  %v388_v22 = vmul.f32 0.6931472, %v1789_v17  ;;  %v1791_v38 = vpop.eup %1790 }
 0x1b6   : > { %988 = vst [vmem:[#allocation1 + $0x6] ss:$9 sm:$0xff] %v846_v36  ;;  %1792 = vlog2.f32 %v606_v19  ;;  %v610_v33 = vadd.f32 1.0, %v609_v30  ;;  %v856_v36 = vperm.slane %v708_v31, 0  ;;  %v359_v54 = vpop.xlane.xlu1 %358  ;;  %vm613_vm13 = vcmp.lt.f32.partialorder %v612_v12, 0.0004427343 }
 0x1b7   : > { %989 = vst [vmem:[#allocation1 + $0x7] ss:$9 sm:$0xff] %v847_v41  ;;  %v407_v32 = vmul.f32 0.7915397, %v388_v22  ;;  %v857_v41 = vperm.slane %v708_v31, 1  ;;  %1794 = vlog2.f32 %v359_v54  ;;  %v862_v19 = vperm.slane %v708_v31, 6 }
 0x1b8   : > { %v863_v22 = vperm.slane %v708_v31, 7 }
 0x1b9   : > { %v2135_v35 = vadd.f32 0.657048, %v407_v32 }
 0x1bb   : > { %v455_v53 = vand.u32 2147483647, %v2135_v35 }
 0x1be   : > { %v990_v55 = vld [vmem:[#allocation1] sm:$0xff] }
 0x1bf   : > { %991 = vst [vmem:[#allocation1] ss:$9 sm:$0xff] %v848_v52  ;;  %1085 = vperm.xlu1 %1716, %v990_v55   ;;  %v1793_v55 = vpop.eup %1792 }
 0x1c0   : > { %992 = vst [vmem:[#allocation1 + $0x1] ss:$9 sm:$0xff] %v849_v59  ;;  %v677_v59 = vsub.f32 0.0, %v2124_v40 }
 0x1c1   : > { %993 = vst [vmem:[#allocation1 + $0x2] ss:$9 sm:$0xff] %v850_v39  ;;  %v390_v39 = vmul.f32 0.6931472, %v1791_v38 }
 0x1c2   : > { %994 = vst [vmem:[#allocation1 + $0x3] ss:$9 sm:$0xff] %v851_v2  ;;  %v608_v2 = vmul.f32 0.6931472, %v1793_v55  ;;  %v693_v32 = vmax.f32 %v677_v59, -9.2103405 }
 0x1c3   : > { %995 = vst [vmem:[#allocation1 + $0x4] ss:$9 sm:$0xff] %v852_v1  ;;  %v611_v1 = vmul.f32 %v1787_v16, %v610_v33 }
 0x1c4   : > { %996 = vst [vmem:[#allocation1 + $0x5] ss:$9 sm:$0xff] %v853_v3  ;;  %v471_v3 = vsub.f32 0.0, %v455_v53  ;;  %v709_v12 = vmin.f32 %v693_v32, -0.000100005 }
 0x1c5   : > { %997 = vst [vmem:[#allocation1 + $0x6] ss:$9 sm:$0xff] %v854_v5  ;;  %v408_v5 = vmul.f32 0.7915397, %v390_v39 }
 0x1c6   : > { %998 = vst [vmem:[#allocation1 + $0x7] ss:$9 sm:$0xff] %v855_v14  ;;  %v614_v14 = vsel %vm613_vm13, %v611_v1, %v608_v2  ;;  %v499_v17 = vmul.f32 1.442695, %v471_v3  ;;  %v865_v31 = vperm.slane %v709_v12, 1  ;;  %v866_v59 = vperm.slane %v709_v12, 2 }
 0x1c7   : > { %v2140_v27 = vadd.f32 %v614_v14, %v438_v58  ;;  %v2142_v30 = vadd.f32 0.657048, %v408_v5  ;;  %v867_v58 = vperm.slane %v709_v12, 3  ;;  %v868_v2 = vperm.slane %v709_v12, 4 }
 0x1c8   : > { %1796 = vpow2.f32 %v499_v17  ;;  %v869_v3 = vperm.slane %v709_v12, 5  ;;  %vm1160_vm13 = vcmask 851712  }
 0x1c9   : > { %v456_v33 = vand.u32 2147483647, %v2142_v30  ;;  %v678_v55 = vsub.f32 0.0, %v2140_v27  ;;  %v2372_v40 = vsub.f32 %v2131_v48, %v2140_v27 }
 0x1cb   : > { %v694_v5 = vmax.f32 %v678_v55, -9.2103405 }
 0x1cd   : > { %v999_v52 = vld [vmem:[#allocation1] sm:$0xff] }
 0x1ce   : > { %1000 = vst [vmem:[#allocation1] ss:$9 sm:$0xff] %v856_v36  ;;  %1088 = vperm.xlu0 %1717, %v999_v52   ;;  %v1795_v36 = vpop.eup %1794 }
 0x1cf   : > { %1001 = vst [vmem:[#allocation1 + $0x1] ss:$9 sm:$0xff] %v857_v41  ;;  %v472_v41 = vsub.f32 0.0, %v456_v33  ;;  %v392_v38 = vmul.f32 0.6931472, %v1795_v36 }
 0x1d0   : > { %1002 = vst [vmem:[#allocation1 + $0x2] ss:$9 sm:$0xff] %v858_v49  ;;  %v710_v36 = vmin.f32 %v694_v5, -0.000100005 }
 0x1d1   : > { %1003 = vst [vmem:[#allocation1 + $0x3] ss:$9 sm:$0xff] %v859_v50  ;;  %v501_v49 = vmul.f32 1.442695, %v472_v41  ;;  %v1797_v50 = vpop.eup %1796  ;;  %v409_v52 = vmul.f32 0.7915397, %v392_v38 }
 0x1d2   : > { %1004 = vst [vmem:[#allocation1 + $0x4] ss:$9 sm:$0xff] %v860_v51  ;;  %v864_v51 = vperm.slane %v709_v12, 0  ;;  %v615_v39 = vadd.f32 1.0, %v1797_v50  ;;  %v618_v54 = vmul.f32 -0.5, %v1797_v50  ;;  %v872_v55 = vperm.slane %v710_v36, 0 }
 0x1d3   : > { %1005 = vst [vmem:[#allocation1 + $0x5] ss:$9 sm:$0xff] %v861_v11  ;;  %1798 = vpow2.f32 %v501_v49  ;;  %v2148_v1 = vadd.f32 0.657048, %v409_v52  ;;  %v870_v11 = vperm.slane %v709_v12, 6  ;;  %v439_v52 = vmax.f32 %v2135_v35, 0.0 }
 0x1d4   : > { %1006 = vst [vmem:[#allocation1 + $0x6] ss:$9 sm:$0xff] %v862_v19  ;;  %1800 = vlog2.f32 %v615_v39  ;;  %v619_v14 = vadd.f32 1.0, %v618_v54  ;;  %v871_v19 = vperm.slane %v709_v12, 7  ;;  %v873_v12 = vperm.slane %v710_v36, 1 }
 0x1d5   : > { %1007 = vst [vmem:[#allocation1 + $0x7] ss:$9 sm:$0xff] %v863_v22  ;;  %v457_v17 = vand.u32 2147483647, %v2148_v1  ;;  %v621_v22 = vand.u32 2147483647, %v1797_v50 }
 0x1d6   : > { %v620_v41 = vmul.f32 %v1797_v50, %v619_v14  ;;  %v876_v50 = vperm.slane %v710_v36, 4 }
 0x1d7   : > { %v473_v32 = vsub.f32 0.0, %v457_v17  ;;  %vm622_vm14 = vcmp.lt.f32.partialorder %v621_v22, 0.0004427343 }
 0x1d9   : > { %v1799_v33 = vpop.eup %1798  ;;  %v503_v49 = vmul.f32 1.442695, %v473_v32  ;;  %v878_v32 = vperm.slane %v710_v36, 6 }
 0x1da   : > { %v624_v38 = vadd.f32 1.0, %v1799_v33  ;;  %v630_v14 = vand.u32 2147483647, %v1799_v33 }
 0x1dc   : > { %v1008_v53 = vld [vmem:[#allocation1] sm:$0xff]  ;;  %1802 = vlog2.f32 %v624_v38  ;;  %vm631_vm15 = vcmp.lt.f32.partialorder %v630_v14, 0.0004427343 }
 0x1dd   : > { %1009 = vst [vmem:[#allocation1] ss:$9 sm:$0xff] %v864_v51  ;;  %1091 = vperm.xlu2 %1715, %v1008_v53   ;;  %v1801_v51 = vpop.eup %1800  ;;  %1804 = vpow2.f32 %v503_v49 }
 0x1de   : > { %1010 = vst [vmem:[#allocation1 + $0x1] ss:$9 sm:$0xff] %v865_v31  ;;  %v617_v53 = vmul.f32 0.6931472, %v1801_v51  ;;  %v627_v31 = vmul.f32 -0.5, %v1799_v33 }
 0x1df   : > { %1011 = vst [vmem:[#allocation1 + $0x2] ss:$9 sm:$0xff] %v866_v59 }
 0x1e0   : > { %1012 = vst [vmem:[#allocation1 + $0x3] ss:$9 sm:$0xff] %v867_v58  ;;  %v623_v59 = vsel %vm622_vm14, %v620_v41, %v617_v53  ;;  %v874_v58 = vperm.slane %v710_v36, 2  ;;  %v879_v41 = vperm.slane %v710_v36, 7  ;;  %vm1164_vm14 = vcmask 917312  }
 0x1e1   : > { %1013 = vst [vmem:[#allocation1 + $0x4] ss:$9 sm:$0xff] %v868_v2  ;;  %v2152_v39 = vadd.f32 %v623_v59, %v439_v52  ;;  %v875_v2 = vperm.slane %v710_v36, 3 }
 0x1e2   : > { %1014 = vst [vmem:[#allocation1 + $0x5] ss:$9 sm:$0xff] %v869_v3  ;;  %v628_v3 = vadd.f32 1.0, %v627_v31  ;;  %v1803_v17 = vpop.eup %1802  ;;  %v440_v31 = vmax.f32 %v2142_v30, 0.0 }
 0x1e3   : > { %1015 = vst [vmem:[#allocation1 + $0x6] ss:$9 sm:$0xff] %v870_v11  ;;  %v679_v5 = vsub.f32 0.0, %v2152_v39  ;;  %v1805_v22 = vpop.eup %1804  ;;  %v626_v49 = vmul.f32 0.6931472, %v1803_v17  ;;  %v2373_v27 = vsub.f32 %v2135_v35, %v2152_v39 }
 0x1e4   : > { %1016 = vst [vmem:[#allocation1 + $0x7] ss:$9 sm:$0xff] %v871_v19  ;;  %v877_v19 = vperm.slane %v710_v36, 5  ;;  %v629_v51 = vmul.f32 %v1799_v33, %v628_v3  ;;  %v633_v52 = vadd.f32 1.0, %v1805_v22  ;;  %v636_v53 = vmul.f32 -0.5, %v1805_v22 }
 0x1e5   : > { %v695_v38 = vmax.f32 %v679_v5, -9.2103405  ;;  %v441_v33 = vmax.f32 %v2148_v1, 0.0 }
 0x1e6   : > { %1806 = vlog2.f32 %v633_v52  ;;  %v632_v59 = vsel %vm631_vm15, %v629_v51, %v626_v49  ;;  %vm1168_vm15 = vcmask 982912  }
 0x1e7   : > { %v2158_v36 = vadd.f32 %v632_v59, %v440_v31 }
 0x1e9   : > { %v2374_v39 = vsub.f32 %v2142_v30, %v2158_v36 }
 0x1eb   : > { %v1017_v54 = vld [vmem:[#allocation1] sm:$0xff]  ;;  %v362_v17 = vpop.xlane.xlu1 %361 }
 0x1ec   : > { %1018 = vst [vmem:[#allocation1] ss:$9 sm:$0xff] %v872_v55  ;;  %1094 = vperm.xlu1 %1716, %v1017_v54   ;;  %v637_v55 = vadd.f32 1.0, %v636_v53  ;;  %v639_v54 = vand.u32 2147483647, %v1805_v22  ;;  %1808 = vlog2.f32 %v362_v17 }
 0x1ed   : > { %1019 = vst [vmem:[#allocation1 + $0x1] ss:$9 sm:$0xff] %v873_v12  ;;  %v711_v12 = vmin.f32 %v695_v38, -0.000100005  ;;  %v680_v38 = vsub.f32 0.0, %v2158_v36 }
 0x1ee   : > { %1020 = vst [vmem:[#allocation1 + $0x2] ss:$9 sm:$0xff] %v874_v58  ;;  %v638_v58 = vmul.f32 %v1805_v22, %v637_v55  ;;  %vm640_vm0 = vcmp.lt.f32.partialorder %v639_v54, 0.0004427343 }
 0x1ef   : > { %1021 = vst [vmem:[#allocation1 + $0x3] ss:$9 sm:$0xff] %v875_v2  ;;  %v1807_v2 = vpop.eup %1806  ;;  %v880_v5 = vperm.slane %v711_v12, 0  ;;  %v881_v3 = vperm.slane %v711_v12, 1  ;;  %v884_v51 = vperm.slane %v711_v12, 4  ;;  %v885_v52 = vperm.slane %v711_v12, 5 }
 0x1f0   : > { %1022 = vst [vmem:[#allocation1 + $0x4] ss:$9 sm:$0xff] %v876_v50  ;;  %v635_v14 = vmul.f32 0.6931472, %v1807_v2  ;;  %v886_v53 = vperm.slane %v711_v12, 6  ;;  %v887_v55 = vperm.slane %v711_v12, 7 }
 0x1f1   : > { %1023 = vst [vmem:[#allocation1 + $0x5] ss:$9 sm:$0xff] %v877_v19  ;;  %v882_v19 = vperm.slane %v711_v12, 2  ;;  %v696_v59 = vmax.f32 %v680_v38, -9.2103405 }
 0x1f2   : > { %1024 = vst [vmem:[#allocation1 + $0x6] ss:$9 sm:$0xff] %v878_v32  ;;  %v641_v49 = vsel %vm640_vm0, %v638_v58, %v635_v14  ;;  %v1809_v54 = vpop.eup %1808  ;;  %vm1172_vm0 = vcmask 1048512  }
 0x1f3   : > { %1025 = vst [vmem:[#allocation1 + $0x7] ss:$9 sm:$0xff] %v879_v41  ;;  %v883_v41 = vperm.slane %v711_v12, 3  ;;  %v2164_v22 = vadd.f32 %v641_v49, %v441_v33  ;;  %v712_v58 = vmin.f32 %v696_v59, -0.000100005 }
 0x1f4   : > { %v394_v2 = vmul.f32 0.6931472, %v1809_v54 }
 0x1f5   : > { %v889_v14 = vperm.slane %v712_v58, 1  ;;  %v890_v17 = vperm.slane %v712_v58, 2  ;;  %v892_v49 = vperm.slane %v712_v58, 4  ;;  %v894_v38 = vperm.slane %v712_v58, 6 }
 0x1f6   : > { %v410_v33 = vmul.f32 0.7915397, %v394_v2  ;;  %v2375_v36 = vsub.f32 %v2148_v1, %v2164_v22 }
 0x1f8   : > { %v2169_v12 = vadd.f32 0.657048, %v410_v33 }
 0x1fa   : > { %v1026_v32 = vld [vmem:[#allocation1] sm:$0xff] }
 0x1fb   : > { %1027 = vst [vmem:[#allocation1] ss:$9 sm:$0xff] %v880_v5  ;;  %1097 = vperm.xlu0 %1717, %v1026_v32   ;;  %v888_v5 = vperm.slane %v712_v58, 0  ;;  %v891_v32 = vperm.slane %v712_v58, 3 }
 0x1fc   : > { %1028 = vst [vmem:[#allocation1 + $0x1] ss:$9 sm:$0xff] %v881_v3 }
 0x1fd   : > { %1029 = vst [vmem:[#allocation1 + $0x2] ss:$9 sm:$0xff] %v882_v19  ;;  %v681_v19 = vsub.f32 0.0, %v2164_v22 }
 0x1fe   : > { %1030 = vst [vmem:[#allocation1 + $0x3] ss:$9 sm:$0xff] %v883_v41  ;;  %v893_v41 = vperm.slane %v712_v58, 5 }
 0x1ff   : > { %1031 = vst [vmem:[#allocation1 + $0x4] ss:$9 sm:$0xff] %v884_v51  ;;  %v458_v51 = vand.u32 2147483647, %v2169_v12 }
 0x200   : > { %1032 = vst [vmem:[#allocation1 + $0x5] ss:$9 sm:$0xff] %v885_v52  ;;  %v895_v52 = vperm.slane %v712_v58, 7 }
 0x201   : > { %1033 = vst [vmem:[#allocation1 + $0x6] ss:$9 sm:$0xff] %v886_v53  ;;  %v697_v53 = vmax.f32 %v681_v19, -9.2103405 }
 0x202   : > { %1034 = vst [vmem:[#allocation1 + $0x7] ss:$9 sm:$0xff] %v887_v55  ;;  %v474_v55 = vsub.f32 0.0, %v458_v51 }
 0x203   : > { %v713_v54 = vmin.f32 %v697_v53, -0.000100005 }
 0x204   : > { %v505_v59 = vmul.f32 1.442695, %v474_v55  ;;  %v442_v55 = vmax.f32 %v2169_v12, 0.0 }
 0x205   : > { %v896_v2 = vperm.slane %v713_v54, 0  ;;  %v898_v33 = vperm.slane %v713_v54, 2  ;;  %v899_v31 = vperm.slane %v713_v54, 3  ;;  %v901_v58 = vperm.slane %v713_v54, 5 }
 0x206   : > { %1810 = vpow2.f32 %v505_v59  ;;  %v902_v19 = vperm.slane %v713_v54, 6 }
 0x209   : > { %v1035_v3 = vld [vmem:[#allocation1] sm:$0xff] }
 0x20a   : > { %1036 = vst [vmem:[#allocation1] ss:$9 sm:$0xff] %v888_v5  ;;  %1100 = vperm.xlu2 %1715, %v1035_v3   ;;  %v897_v5 = vperm.slane %v713_v54, 1 }
 0x20b   : > { %1037 = vst [vmem:[#allocation1 + $0x1] ss:$9 sm:$0xff] %v889_v14 }
 0x20c   : > { %1038 = vst [vmem:[#allocation1 + $0x2] ss:$9 sm:$0xff] %v890_v17  ;;  %v1811_v3 = vpop.eup %1810  ;;  %v900_v17 = vperm.slane %v713_v54, 4 }
 0x20d   : > { %1039 = vst [vmem:[#allocation1 + $0x3] ss:$9 sm:$0xff] %v891_v32  ;;  %v642_v50 = vadd.f32 1.0, %v1811_v3  ;;  %v645_v32 = vmul.f32 -0.5, %v1811_v3 }
 0x20e   : > { %1040 = vst [vmem:[#allocation1 + $0x4] ss:$9 sm:$0xff] %v892_v49  ;;  %v903_v49 = vperm.slane %v713_v54, 7 }
 0x20f   : > { %1041 = vst [vmem:[#allocation1 + $0x5] ss:$9 sm:$0xff] %v893_v41  ;;  %1812 = vlog2.f32 %v642_v50  ;;  %v646_v41 = vadd.f32 1.0, %v645_v32 }
 0x210   : > { %1042 = vst [vmem:[#allocation1 + $0x6] ss:$9 sm:$0xff] %v894_v38  ;;  %v648_v38 = vand.u32 2147483647, %v1811_v3 }
 0x211   : > { %1043 = vst [vmem:[#allocation1 + $0x7] ss:$9 sm:$0xff] %v895_v52  ;;  %v647_v53 = vmul.f32 %v1811_v3, %v646_v41 }
 0x212   : > { %vm649_vm1 = vcmp.lt.f32.partialorder %v648_v38, 0.0004427343  ;;  %v731_v38 = vmax.f32 %v715_v13, -9.2103405 }
 0x215   : > { %v1813_v51 = vpop.eup %1812 }
 0x216   : > { %v644_v52 = vmul.f32 0.6931472, %v1813_v51  ;;  %v1068_v51 = vpop.permute.xlu1 %1067 }
 0x218   : > { %v1044_v14 = vld [vmem:[#allocation1] sm:$0xff]  ;;  %v650_v59 = vsel %vm649_vm1, %v647_v53, %v644_v52  ;;  %v747_v52 = vmin.f32 %v731_v38, -0.000100005 }
 0x219   : > { %1045 = vst [vmem:[#allocation1] ss:$9 sm:$0xff] %v896_v2  ;;  %1103 = vperm.xlu1 %1716, %v1044_v14   ;;  %v2173_v2 = vadd.f32 %v650_v59, %v442_v55 }
 0x21a   : > { %1046 = vst [vmem:[#allocation1 + $0x1] ss:$9 sm:$0xff] %v897_v5  ;;  %v1196_v53 = vperm.slane %v747_v52, 0  ;;  %v1197_v55 = vperm.slane %v747_v52, 1  ;;  %v1202_v7 = vperm.slane %v747_v52, 6  ;;  %v1203_v13 = vperm.slane %v747_v52, 7 }
 0x21b   : > { %1047 = vst [vmem:[#allocation1 + $0x2] ss:$9 sm:$0xff] %v898_v33  ;;  %v682_v50 = vsub.f32 0.0, %v2173_v2  ;;  %v2376_v22 = vsub.f32 %v2169_v12, %v2173_v2 }
 0x21c   : > { %1048 = vst [vmem:[#allocation1 + $0x3] ss:$9 sm:$0xff] %v899_v31 }
 0x21d   : > { %1049 = vst [vmem:[#allocation1 + $0x4] ss:$9 sm:$0xff] %v900_v17  ;;  %v698_v54 = vmax.f32 %v682_v50, -9.2103405  ;;  %v1198_v50 = vperm.slane %v747_v52, 2 }
 0x21e   : > { %1050 = vst [vmem:[#allocation1 + $0x5] ss:$9 sm:$0xff] %v901_v58 }
 0x21f   : > { %1051 = vst [vmem:[#allocation1 + $0x6] ss:$9 sm:$0xff] %v902_v19  ;;  %v714_v33 = vmin.f32 %v698_v54, -0.000100005  ;;  %v1199_v54 = vperm.slane %v747_v52, 3 }
 0x220   : > { %1052 = vst [vmem:[#allocation1 + $0x7] ss:$9 sm:$0xff] %v903_v49 }
 0x221   : > { %v904_v14 = vperm.slane %v714_v33, 0  ;;  %v905_v17 = vperm.slane %v714_v33, 1  ;;  %v906_v58 = vperm.slane %v714_v33, 2  ;;  %v907_v32 = vperm.slane %v714_v33, 3 }
 0x222   : > { %v908_v3 = vperm.slane %v714_v33, 4  ;;  %v909_v19 = vperm.slane %v714_v33, 5  ;;  %v910_v49 = vperm.slane %v714_v33, 6  ;;  %v911_v41 = vperm.slane %v714_v33, 7 }
 0x223   : > { %v2366_v33 = vlaneseq }
 0x227   : > { %v1053_v5 = vld [vmem:[#allocation1] sm:$0xff] }
 0x228   : > { %1106 = vperm.xlu0 %1717, %v1053_v5   ;;  %1054 = vst [vmem:[#allocation1] ss:$9 sm:$0xff] %v904_v14  ;;  %v1071_v5 = vpop.permute.xlu1 %1070  ;;  %v1200_v14 = vperm.slane %v747_v52, 4 }
 0x229   : > { %1055 = vst [vmem:[#allocation1 + $0x1] ss:$9 sm:$0xff] %v905_v17  ;;  %v1201_v17 = vperm.slane %v747_v52, 5 }
 0x22a   : > { %1056 = vst [vmem:[#allocation1 + $0x2] ss:$9 sm:$0xff] %v906_v58  ;;  %v2187_v58 = vand.u32 127, %v2366_v33 }
 0x22b   : > { %1057 = vst [vmem:[#allocation1 + $0x3] ss:$9 sm:$0xff] %v907_v32  ;;  %v1065_v32 = vpop.permute.xlu2 %1064 }
 0x22c   : > { %1058 = vst [vmem:[#allocation1 + $0x4] ss:$9 sm:$0xff] %v908_v3  ;;  %v2190_v3 = vadd.s32 4294967288, %v2187_v58  ;;  %v2196_v23 = vadd.s32 4294967272, %v2187_v58  ;;  %v1113_v52 = vperm.slane %v1065_v32, %v2187_v58 }
 0x22d   : > { %1059 = vst [vmem:[#allocation1 + $0x5] ss:$9 sm:$0xff] %v909_v19 }
 0x22e   : > { %1060 = vst [vmem:[#allocation1 + $0x6] ss:$9 sm:$0xff] %v910_v49  ;;  %v748_v49 = vmin.f32 %v732_v6, -0.000100005  ;;  %v1115_v56 = vperm.slane %v1068_v51, %v2190_v3  ;;  %v2209_v51 = vadd.s32 4294967264, %v2187_v58 }
 0x22f   : > { %1061 = vst [vmem:[#allocation1 + $0x7] ss:$9 sm:$0xff] %v911_v41  ;;  %v2193_v41 = vadd.s32 4294967280, %v2187_v58 }
 0x230   : > { %v1074_v19 = vpop.permute.xlu1 %1073  ;;  %v1204_v61 = vperm.slane %v748_v49, 0  ;;  %v1117_v6 = vsel %vm1116_vm2, %v1115_v56, %v1113_v52  ;;  %v1207_v32 = vperm.slane %v748_v49, 3  ;;  %v1208_v31 = vperm.slane %v748_v49, 4 }
 0x231   : > { %v1119_v38 = vperm.slane %v1071_v5, %v2193_v41  ;;  %v1209_v9 = vperm.slane %v748_v49, 5  ;;  %v1210_v52 = vperm.slane %v748_v49, 6 }
 0x233   : > { %v1083_v5 = vpop.permute.xlu2 %1082 }
 0x236   : > { %v2181_v59 = vld [vmem:[#allocation1] sm:$0xff] }
 0x237   : > { %1324 = vst [vmem:[#allocation1] ss:$9 sm:$0xff] %v1196_v53  ;;  %v2202_v53 = vadd.s32 4294967256, %v2187_v58 }
 0x238   : > { %1326 = vst [vmem:[#allocation1 + $0x1] ss:$9 sm:$0xff] %v1197_v55  ;;  %v1123_v55 = vperm.slane %v1074_v19, %v2196_v23  ;;  %v1121_v19 = vsel %vm1120_vm3, %v1119_v38, %v1117_v6 }
 0x239   : > { %1328 = vst [vmem:[#allocation1 + $0x2] ss:$9 sm:$0xff] %v1198_v50  ;;  %v1205_v50 = vperm.slane %v748_v49, 1 }
 0x23a   : > { %1330 = vst [vmem:[#allocation1 + $0x3] ss:$9 sm:$0xff] %v1199_v54  ;;  %v1125_v16 = vsel %vm1124_vm4, %v1123_v55, %v1121_v19 }
 0x23b   : > { %1332 = vst [vmem:[#allocation1 + $0x4] ss:$9 sm:$0xff] %v1200_v14  ;;  %v2206_v14 = vadd.s32 4294967248, %v2187_v58 }
 0x23c   : > { %1334 = vst [vmem:[#allocation1 + $0x5] ss:$9 sm:$0xff] %v1201_v17  ;;  %v1080_v17 = vpop.permute.xlu0 %1079 }
 0x23d   : > { %1336 = vst [vmem:[#allocation1 + $0x6] ss:$9 sm:$0xff] %v1202_v7  ;;  %v1206_v7 = vperm.slane %v748_v49, 2  ;;  %v1131_v11 = vperm.slane %v1080_v17, %v2202_v53  ;;  %v2224_v17 = vadd.s32 4294967232, %v2187_v58 }
 0x23e   : > { %1338 = vst [vmem:[#allocation1 + $0x7] ss:$9 sm:$0xff] %v1203_v13  ;;  %v1077_v13 = vpop.permute.xlu1 %1076 }
 0x23f   : > { %v1127_v33 = vperm.slane %v1077_v13, %v2209_v51 }
 0x241   : > { %v1129_v56 = vsel %vm1128_vm5, %v1127_v33, %v1125_v16  ;;  %v2227_v16 = vadd.s32 4294967224, %v2187_v58  ;;  %v1092_v33 = vpop.permute.xlu2 %1091 }
 0x242   : > { %v1133_v38 = vsel %vm1132_vm6, %v1131_v11, %v1129_v56  ;;  %v2230_v11 = vadd.s32 4294967240, %v2187_v58 }
 0x245   : > { %v1339_v54 = vld [vmem:[#allocation1] sm:$0xff] }
 0x246   : > { %1340 = vst [vmem:[#allocation1] ss:$9 sm:$0xff] %v1204_v61  ;;  %1476 = vperm.xlu0 %1717, %v1339_v54   ;;  %v1135_v61 = vperm.slane %v1083_v5, %v2206_v14  ;;  %v1211_v54 = vperm.slane %v748_v49, 7 }
 0x247   : > { %1341 = vst [vmem:[#allocation1 + $0x1] ss:$9 sm:$0xff] %v1205_v50  ;;  %v733_v50 = vmax.f32 %v717_v15, -9.2103405 }
 0x248   : > { %1342 = vst [vmem:[#allocation1 + $0x2] ss:$9 sm:$0xff] %v1206_v7  ;;  %v1137_v55 = vsel %vm1136_vm7, %v1135_v61, %v1133_v38  ;;  %v1086_v7 = vpop.permute.xlu1 %1085 }
 0x249   : > { %1343 = vst [vmem:[#allocation1 + $0x3] ss:$9 sm:$0xff] %v1207_v32  ;;  %v749_v8 = vmin.f32 %v733_v50, -0.000100005  ;;  %v1139_v10 = vperm.slane %v1086_v7, %v2230_v11 }
 0x24a   : > { %1344 = vst [vmem:[#allocation1 + $0x4] ss:$9 sm:$0xff] %v1208_v31  ;;  %v1089_v31 = vpop.permute.xlu0 %1088 }
 0x24b   : > { %1345 = vst [vmem:[#allocation1 + $0x5] ss:$9 sm:$0xff] %v1209_v9  ;;  %v1143_v15 = vperm.slane %v1089_v31, %v2224_v17  ;;  %v1147_v9 = vperm.slane %v1092_v33, %v2227_v16  ;;  %v1141_v49 = vsel %vm1140_vm8, %v1139_v10, %v1137_v55  ;;  %v1212_v6 = vperm.slane %v749_v8, 0 }
 0x24c   : > { %1346 = vst [vmem:[#allocation1 + $0x6] ss:$9 sm:$0xff] %v1210_v52  ;;  %v1213_v32 = vperm.slane %v749_v8, 1  ;;  %v1214_v61 = vperm.slane %v749_v8, 2  ;;  %v1215_v56 = vperm.slane %v749_v8, 3  ;;  %v1216_v52 = vperm.slane %v749_v8, 4 }
 0x24d   : > { %1347 = vst [vmem:[#allocation1 + $0x7] ss:$9 sm:$0xff] %v1211_v54  ;;  %v1145_v5 = vsel %vm1144_vm9, %v1143_v15, %v1141_v49  ;;  %v1217_v38 = vperm.slane %v749_v8, 5  ;;  %v1218_v50 = vperm.slane %v749_v8, 6  ;;  %v1219_v54 = vperm.slane %v749_v8, 7 }
 0x24e   : > { %v2238_v13 = vsel %vm1148_vm10, %v1147_v9, %v1145_v5  ;;  %v734_v55 = vmax.f32 %v718_v63, -9.2103405  ;;  %v751_v63 = vmin.f32 %v735_v62, -0.000100005  ;;  %v1246_v62 = vperm.slane %v753_v45, 2 }
 0x250   : > { %v750_v31 = vmin.f32 %v734_v55, -0.000100005  ;;  %v1235_v25 = vperm.slane %v751_v63, 7  ;;  %v1237_v55 = vperm.slane %v752_v4, 1 }
 0x252   : > { %v1220_v33 = vperm.slane %v750_v31, 0  ;;  %v1221_v7 = vperm.slane %v750_v31, 1  ;;  %v1222_v15 = vperm.slane %v750_v31, 2  ;;  %v1223_v9 = vperm.slane %v750_v31, 3 }
 0x253   : > { %v1224_v49 = vperm.slane %v750_v31, 4  ;;  %v1225_v5 = vperm.slane %v750_v31, 5  ;;  %v1226_v8 = vperm.slane %v750_v31, 6  ;;  %v1227_v57 = vperm.slane %v750_v31, 7 }
 0x254   : > { %v1348_v19 = vld [vmem:[#allocation1] sm:$0xff] }
 0x255   : > { %1349 = vst [vmem:[#allocation1] ss:$9 sm:$0xff] %v1212_v6  ;;  %1479 = vperm.xlu2 %1715, %v1348_v19   ;;  %v1228_v6 = vperm.slane %v751_v63, 0 }
 0x256   : > { %1350 = vst [vmem:[#allocation1 + $0x1] ss:$9 sm:$0xff] %v1213_v32  ;;  %v1229_v32 = vperm.slane %v751_v63, 1 }
 0x257   : > { %1351 = vst [vmem:[#allocation1 + $0x2] ss:$9 sm:$0xff] %v1214_v61  ;;  %v1230_v61 = vperm.slane %v751_v63, 2 }
 0x258   : > { %1352 = vst [vmem:[#allocation1 + $0x3] ss:$9 sm:$0xff] %v1215_v56  ;;  %v1231_v56 = vperm.slane %v751_v63, 3 }
 0x259   : > { %1353 = vst [vmem:[#allocation1 + $0x4] ss:$9 sm:$0xff] %v1216_v52  ;;  %v1232_v52 = vperm.slane %v751_v63, 4 }
 0x25a   : > { %1354 = vst [vmem:[#allocation1 + $0x5] ss:$9 sm:$0xff] %v1217_v38  ;;  %v1233_v38 = vperm.slane %v751_v63, 5 }
 0x25b   : > { %1355 = vst [vmem:[#allocation1 + $0x6] ss:$9 sm:$0xff] %v1218_v50  ;;  %v1234_v50 = vperm.slane %v751_v63, 6  ;;  %v1248_v63 = vperm.slane %v753_v45, 4 }
 0x25c   : > { %1356 = vst [vmem:[#allocation1 + $0x7] ss:$9 sm:$0xff] %v1219_v54  ;;  %v1236_v54 = vperm.slane %v752_v4, 0 }
 0x263   : > { %v1357_v10 = vld [vmem:[#allocation1] sm:$0xff] }
 0x264   : > { %1358 = vst [vmem:[#allocation1] ss:$9 sm:$0xff] %v1220_v33  ;;  %1482 = vperm.xlu2 %1715, %v1357_v10   ;;  %v1238_v33 = vperm.slane %v752_v4, 2  ;;  %v1240_v10 = vperm.slane %v752_v4, 4 }
 0x265   : > { %1359 = vst [vmem:[#allocation1 + $0x1] ss:$9 sm:$0xff] %v1221_v7  ;;  %v1239_v7 = vperm.slane %v752_v4, 3 }
 0x266   : > { %1360 = vst [vmem:[#allocation1 + $0x2] ss:$9 sm:$0xff] %v1222_v15  ;;  %v1241_v15 = vperm.slane %v752_v4, 5 }
 0x267   : > { %1361 = vst [vmem:[#allocation1 + $0x3] ss:$9 sm:$0xff] %v1223_v9  ;;  %v1242_v9 = vperm.slane %v752_v4, 6  ;;  %v1260_v4 = vperm.slane %v755_v46, 0 }
 0x268   : > { %1362 = vst [vmem:[#allocation1 + $0x4] ss:$9 sm:$0xff] %v1224_v49  ;;  %v1244_v49 = vperm.slane %v753_v45, 0 }
 0x269   : > { %1363 = vst [vmem:[#allocation1 + $0x5] ss:$9 sm:$0xff] %v1225_v5  ;;  %v1245_v5 = vperm.slane %v753_v45, 1 }
 0x26a   : > { %1364 = vst [vmem:[#allocation1 + $0x6] ss:$9 sm:$0xff] %v1226_v8 }
 0x26b   : > { %1365 = vst [vmem:[#allocation1 + $0x7] ss:$9 sm:$0xff] %v1227_v57  ;;  %v1247_v57 = vperm.slane %v753_v45, 3 }
 0x272   : > { %v1366_v19 = vld [vmem:[#allocation1] sm:$0xff] }
 0x273   : > { %1367 = vst [vmem:[#allocation1] ss:$9 sm:$0xff] %v1228_v6  ;;  %1485 = vperm.xlu2 %1715, %v1366_v19   ;;  %v1249_v6 = vperm.slane %v753_v45, 5  ;;  %v1252_v19 = vperm.slane %v754_v21, 0 }
 0x274   : > { %1368 = vst [vmem:[#allocation1 + $0x1] ss:$9 sm:$0xff] %v1229_v32  ;;  %v1250_v32 = vperm.slane %v753_v45, 6  ;;  %v1270_v45 = vperm.slane %v756_v29, 2 }
 0x275   : > { %1369 = vst [vmem:[#allocation1 + $0x2] ss:$9 sm:$0xff] %v1230_v61  ;;  %v1253_v61 = vperm.slane %v754_v21, 1 }
 0x276   : > { %1370 = vst [vmem:[#allocation1 + $0x3] ss:$9 sm:$0xff] %v1231_v56 }
 0x277   : > { %1371 = vst [vmem:[#allocation1 + $0x4] ss:$9 sm:$0xff] %v1232_v52  ;;  %v1254_v52 = vperm.slane %v754_v21, 2 }
 0x278   : > { %1372 = vst [vmem:[#allocation1 + $0x5] ss:$9 sm:$0xff] %v1233_v38  ;;  %v1255_v38 = vperm.slane %v754_v21, 3 }
 0x279   : > { %1373 = vst [vmem:[#allocation1 + $0x6] ss:$9 sm:$0xff] %v1234_v50  ;;  %v1256_v50 = vperm.slane %v754_v21, 4 }
 0x27a   : > { %1374 = vst [vmem:[#allocation1 + $0x7] ss:$9 sm:$0xff] %v1235_v25  ;;  %v1257_v25 = vperm.slane %v754_v21, 5 }
 0x281   : > { %v1375_v31 = vld [vmem:[#allocation1] sm:$0xff] }
 0x282   : > { %1376 = vst [vmem:[#allocation1] ss:$9 sm:$0xff] %v1236_v54  ;;  %1488 = vperm.xlu2 %1715, %v1375_v31   ;;  %v1261_v54 = vperm.slane %v755_v46, 1  ;;  %v1262_v31 = vperm.slane %v755_v46, 2 }
 0x283   : > { %1377 = vst [vmem:[#allocation1 + $0x1] ss:$9 sm:$0xff] %v1237_v55 }
 0x284   : > { %1378 = vst [vmem:[#allocation1 + $0x2] ss:$9 sm:$0xff] %v1238_v33  ;;  %v1263_v33 = vperm.slane %v755_v46, 3 }
 0x285   : > { %1379 = vst [vmem:[#allocation1 + $0x3] ss:$9 sm:$0xff] %v1239_v7  ;;  %v1264_v7 = vperm.slane %v755_v46, 4 }
 0x286   : > { %1380 = vst [vmem:[#allocation1 + $0x4] ss:$9 sm:$0xff] %v1240_v10  ;;  %v1265_v10 = vperm.slane %v755_v46, 5 }
 0x287   : > { %1381 = vst [vmem:[#allocation1 + $0x5] ss:$9 sm:$0xff] %v1241_v15  ;;  %v1266_v15 = vperm.slane %v755_v46, 6 }
 0x288   : > { %1382 = vst [vmem:[#allocation1 + $0x6] ss:$9 sm:$0xff] %v1242_v9  ;;  %v1268_v9 = vperm.slane %v756_v29, 0 }
 0x289   : > { %1383 = vst [vmem:[#allocation1 + $0x7] ss:$9 sm:$0xff] %v1243_v47  ;;  %v1269_v47 = vperm.slane %v756_v29, 1 }
 0x290   : > { %v1384_v8 = vld [vmem:[#allocation1] sm:$0xff] }
 0x291   : > { %1385 = vst [vmem:[#allocation1] ss:$9 sm:$0xff] %v1244_v49  ;;  %1491 = vperm.xlu1 %1716, %v1384_v8   ;;  %v1271_v49 = vperm.slane %v756_v29, 3  ;;  %v1273_v8 = vperm.slane %v756_v29, 5 }
 0x292   : > { %1386 = vst [vmem:[#allocation1 + $0x1] ss:$9 sm:$0xff] %v1245_v5  ;;  %v1272_v5 = vperm.slane %v756_v29, 4 }
 0x293   : > { %1387 = vst [vmem:[#allocation1 + $0x2] ss:$9 sm:$0xff] %v1246_v62  ;;  %v1274_v62 = vperm.slane %v756_v29, 6 }
 0x294   : > { %1388 = vst [vmem:[#allocation1 + $0x3] ss:$9 sm:$0xff] %v1247_v57  ;;  %v757_v57 = vmin.f32 %v741_v44, -0.000100005  ;;  %v745_v44 = vmax.f32 %v2375_v36, -9.2103405 }
 0x295   : > { %1389 = vst [vmem:[#allocation1 + $0x4] ss:$9 sm:$0xff] %v1248_v63 }
 0x296   : > { %1390 = vst [vmem:[#allocation1 + $0x5] ss:$9 sm:$0xff] %v1249_v6  ;;  %v1276_v63 = vperm.slane %v757_v57, 0  ;;  %v1277_v6 = vperm.slane %v757_v57, 1  ;;  %v1279_v18 = vperm.slane %v757_v57, 3  ;;  %v1280_v21 = vperm.slane %v757_v57, 4 }
 0x297   : > { %1391 = vst [vmem:[#allocation1 + $0x6] ss:$9 sm:$0xff] %v1250_v32  ;;  %v1283_v20 = vperm.slane %v757_v57, 7 }
 0x298   : > { %1392 = vst [vmem:[#allocation1 + $0x7] ss:$9 sm:$0xff] %v1251_v26  ;;  %v1278_v26 = vperm.slane %v757_v57, 2 }
 0x29f   : > { %v1393_v56 = vld [vmem:[#allocation1] sm:$0xff] }
 0x2a0   : > { %1394 = vst [vmem:[#allocation1] ss:$9 sm:$0xff] %v1252_v19  ;;  %1494 = vperm.xlu0 %1717, %v1393_v56   ;;  %v1281_v19 = vperm.slane %v757_v57, 5  ;;  %v742_v56 = vmax.f32 %v2372_v40, -9.2103405 }
 0x2a1   : > { %1395 = vst [vmem:[#allocation1 + $0x1] ss:$9 sm:$0xff] %v1253_v61  ;;  %v1282_v61 = vperm.slane %v757_v57, 6  ;;  %v761_v57 = vmin.f32 %v745_v44, -0.000100005 }
 0x2a2   : > { %1396 = vst [vmem:[#allocation1 + $0x2] ss:$9 sm:$0xff] %v1254_v52  ;;  %v758_v52 = vmin.f32 %v742_v56, -0.000100005 }
 0x2a3   : > { %1397 = vst [vmem:[#allocation1 + $0x3] ss:$9 sm:$0xff] %v1255_v38  ;;  %v1315_v1 = vperm.slane %v761_v57, 7 }
 0x2a4   : > { %1398 = vst [vmem:[#allocation1 + $0x4] ss:$9 sm:$0xff] %v1256_v50  ;;  %v1284_v38 = vperm.slane %v758_v52, 0  ;;  %v1285_v50 = vperm.slane %v758_v52, 1  ;;  %v1288_v43 = vperm.slane %v758_v52, 4  ;;  %v1289_v46 = vperm.slane %v758_v52, 5 }
 0x2a5   : > { %1399 = vst [vmem:[#allocation1 + $0x5] ss:$9 sm:$0xff] %v1257_v25  ;;  %v1291_v48 = vperm.slane %v758_v52, 7 }
 0x2a6   : > { %1400 = vst [vmem:[#allocation1 + $0x6] ss:$9 sm:$0xff] %v1258_v0  ;;  %v1286_v0 = vperm.slane %v758_v52, 2 }
 0x2a7   : > { %1401 = vst [vmem:[#allocation1 + $0x7] ss:$9 sm:$0xff] %v1259_v24  ;;  %v1287_v24 = vperm.slane %v758_v52, 3 }
 0x2ae   : > { %v1402_v55 = vld [vmem:[#allocation1] sm:$0xff] }
 0x2af   : > { %1497 = vperm.xlu2 %1715, %v1402_v55   ;;  %1403 = vst [vmem:[#allocation1] ss:$9 sm:$0xff] %v1260_v4  ;;  %v1290_v4 = vperm.slane %v758_v52, 6 }
 0x2b0   : > { %1404 = vst [vmem:[#allocation1 + $0x1] ss:$9 sm:$0xff] %v1261_v54  ;;  %v743_v54 = vmax.f32 %v2373_v27, -9.2103405  ;;  %v1098_v27 = vpop.permute.xlu0 %1097 }
 0x2b1   : > { %1405 = vst [vmem:[#allocation1 + $0x2] ss:$9 sm:$0xff] %v1262_v31 }
 0x2b2   : > { %1406 = vst [vmem:[#allocation1 + $0x3] ss:$9 sm:$0xff] %v1263_v33  ;;  %v759_v55 = vmin.f32 %v743_v54, -0.000100005  ;;  %v1095_v54 = vpop.permute.xlu1 %1094 }
 0x2b3   : > { %1407 = vst [vmem:[#allocation1 + $0x4] ss:$9 sm:$0xff] %v1264_v7 }
 0x2b4   : > { %1408 = vst [vmem:[#allocation1 + $0x5] ss:$9 sm:$0xff] %v1265_v10  ;;  %v1292_v31 = vperm.slane %v759_v55, 0  ;;  %v1293_v33 = vperm.slane %v759_v55, 1  ;;  %v1294_v10 = vperm.slane %v759_v55, 2  ;;  %v1296_v28 = vperm.slane %v759_v55, 4 }
 0x2b5   : > { %1409 = vst [vmem:[#allocation1 + $0x6] ss:$9 sm:$0xff] %v1266_v15  ;;  %v1295_v15 = vperm.slane %v759_v55, 3  ;;  %v1298_v29 = vperm.slane %v759_v55, 6  ;;  %v1299_v35 = vperm.slane %v759_v55, 7 }
 0x2b6   : > { %1410 = vst [vmem:[#allocation1 + $0x7] ss:$9 sm:$0xff] %v1267_v60  ;;  %v1297_v60 = vperm.slane %v759_v55, 5 }
 0x2bd   : > { %v1411_v37 = vld [vmem:[#allocation1] sm:$0xff] }
 0x2be   : > { %1500 = vperm.xlu1 %1716, %v1411_v37   ;;  %1412 = vst [vmem:[#allocation1] ss:$9 sm:$0xff] %v1268_v9  ;;  %v744_v9 = vmax.f32 %v2374_v39, -9.2103405  ;;  %v763_v39 = vld [vmem:[%s190_s22] sm:$0x1] }
 0x2bf   : > { %1413 = vst [vmem:[#allocation1 + $0x1] ss:$9 sm:$0xff] %v1269_v47 }
 0x2c0   : > { %1414 = vst [vmem:[#allocation1 + $0x2] ss:$9 sm:$0xff] %v1270_v45  ;;  %v760_v47 = vmin.f32 %v744_v9, -0.000100005 }
 0x2c1   : > { %1415 = vst [vmem:[#allocation1 + $0x3] ss:$9 sm:$0xff] %v1271_v49 }
 0x2c2   : > { %1416 = vst [vmem:[#allocation1 + $0x4] ss:$9 sm:$0xff] %v1272_v5  ;;  %v1300_v37 = vperm.slane %v760_v47, 0  ;;  %v1301_v45 = vperm.slane %v760_v47, 1  ;;  %v1302_v5 = vperm.slane %v760_v47, 2  ;;  %v1306_v34 = vperm.slane %v760_v47, 6 }
 0x2c3   : > { %1417 = vst [vmem:[#allocation1 + $0x5] ss:$9 sm:$0xff] %v1273_v8  ;;  %v1303_v8 = vperm.slane %v760_v47, 3  ;;  %v1307_v30 = vperm.slane %v760_v47, 7 }
 0x2c4   : > { %1418 = vst [vmem:[#allocation1 + $0x6] ss:$9 sm:$0xff] %v1274_v62  ;;  %v1304_v62 = vperm.slane %v760_v47, 4 }
 0x2c5   : > { %1419 = vst [vmem:[#allocation1 + $0x7] ss:$9 sm:$0xff] %v1275_v42  ;;  %v1305_v42 = vperm.slane %v760_v47, 5 }
 0x2cc   : > { %v1420_v32 = vld [vmem:[#allocation1] sm:$0xff] }
 0x2cd   : > { %1503 = vperm.xlu0 %1717, %v1420_v32   ;;  %1421 = vst [vmem:[#allocation1] ss:$9 sm:$0xff] %v1276_v63  ;;  %v1308_v63 = vperm.slane %v761_v57, 0 }
 0x2ce   : > { %1422 = vst [vmem:[#allocation1 + $0x1] ss:$9 sm:$0xff] %v1277_v6  ;;  %v1309_v6 = vperm.slane %v761_v57, 1 }
 0x2cf   : > { %1423 = vst [vmem:[#allocation1 + $0x2] ss:$9 sm:$0xff] %v1278_v26  ;;  %v1310_v26 = vperm.slane %v761_v57, 2 }
 0x2d0   : > { %1424 = vst [vmem:[#allocation1 + $0x3] ss:$9 sm:$0xff] %v1279_v18  ;;  %v1311_v18 = vperm.slane %v761_v57, 3 }
 0x2d1   : > { %1425 = vst [vmem:[#allocation1 + $0x4] ss:$9 sm:$0xff] %v1280_v21  ;;  %v1312_v21 = vperm.slane %v761_v57, 4 }
 0x2d2   : > { %1426 = vst [vmem:[#allocation1 + $0x5] ss:$9 sm:$0xff] %v1281_v19  ;;  %v1313_v19 = vperm.slane %v761_v57, 5 }
 0x2d3   : > { %1427 = vst [vmem:[#allocation1 + $0x6] ss:$9 sm:$0xff] %v1282_v61  ;;  %v1314_v61 = vperm.slane %v761_v57, 6 }
 0x2d4   : > { %1428 = vst [vmem:[#allocation1 + $0x7] ss:$9 sm:$0xff] %v1283_v20  ;;  %v746_v20 = vmax.f32 %v2376_v22, -9.2103405 }
 0x2d6   : > { %v762_v40 = vmin.f32 %v746_v20, -0.000100005  ;;  %v1170_v20 = vadd.s32 4294967176, %v2187_v58 }
 0x2d8   : > { %v1316_v56 = vperm.slane %v762_v40, 0  ;;  %v1317_v52 = vperm.slane %v762_v40, 1  ;;  %v1322_v12 = vperm.slane %v762_v40, 6  ;;  %v1323_v2 = vperm.slane %v762_v40, 7 }
 0x2db   : > { %v1429_v25 = vld [vmem:[#allocation1] sm:$0xff] }
 0x2dc   : > { %1506 = vperm.xlu2 %1715, %v1429_v25   ;;  %1430 = vst [vmem:[#allocation1] ss:$9 sm:$0xff] %v1284_v38  ;;  %v1319_v25 = vperm.slane %v762_v40, 3 }
 0x2dd   : > { %1431 = vst [vmem:[#allocation1 + $0x1] ss:$9 sm:$0xff] %v1285_v50  ;;  %v1318_v50 = vperm.slane %v762_v40, 2 }
 0x2de   : > { %1432 = vst [vmem:[#allocation1 + $0x2] ss:$9 sm:$0xff] %v1286_v0  ;;  %v1320_v0 = vperm.slane %v762_v40, 4 }
 0x2df   : > { %1433 = vst [vmem:[#allocation1 + $0x3] ss:$9 sm:$0xff] %v1287_v24  ;;  %v1321_v24 = vperm.slane %v762_v40, 5 }
 0x2e0   : > { %1434 = vst [vmem:[#allocation1 + $0x4] ss:$9 sm:$0xff] %v1288_v43  ;;  %v2280_v43 = vpop.permute.xlu2 %1100 }
 0x2e1   : > { %1435 = vst [vmem:[#allocation1 + $0x5] ss:$9 sm:$0xff] %v1289_v46 }
 0x2e2   : > { %1436 = vst [vmem:[#allocation1 + $0x6] ss:$9 sm:$0xff] %v1290_v4 }
 0x2e3   : > { %1437 = vst [vmem:[#allocation1 + $0x7] ss:$9 sm:$0xff] %v1291_v48 }
 0x2e8   : > { %v1480_v46 = vpop.permute.xlu2 %1479 }
 0x2ea   : > { %v1438_v7 = vld [vmem:[#allocation1] sm:$0xff] }
 0x2eb   : > { %1509 = vperm.xlu1 %1716, %v1438_v7   ;;  %1439 = vst [vmem:[#allocation1] ss:$9 sm:$0xff] %v1292_v31  ;;  %v2282_v31 = vpop.permute.xlu0 %1106 }
 0x2ec   : > { %1440 = vst [vmem:[#allocation1 + $0x1] ss:$9 sm:$0xff] %v1293_v33  ;;  %v2284_v33 = vpop.permute.xlu1 %1103 }
 0x2ed   : > { %1441 = vst [vmem:[#allocation1 + $0x2] ss:$9 sm:$0xff] %v1294_v10 }
 0x2ee   : > { %1442 = vst [vmem:[#allocation1 + $0x3] ss:$9 sm:$0xff] %v1295_v15 }
 0x2ef   : > { %1443 = vst [vmem:[#allocation1 + $0x4] ss:$9 sm:$0xff] %v1296_v28 }
 0x2f0   : > { %1444 = vst [vmem:[#allocation1 + $0x5] ss:$9 sm:$0xff] %v1297_v60  ;;  %v1483_v4 = vpop.permute.xlu2 %1482 }
 0x2f1   : > { %1445 = vst [vmem:[#allocation1 + $0x6] ss:$9 sm:$0xff] %v1298_v29 }
 0x2f2   : > { %1446 = vst [vmem:[#allocation1 + $0x7] ss:$9 sm:$0xff] %v1299_v35  ;;  %v1524_v35 = vperm.slane %v1480_v46, %v2190_v3 }
 0x2f3   : > { %v1477_v10 = vpop.permute.xlu0 %1476 }
 0x2f4   : > { %v1523_v60 = vperm.slane %v1477_v10, %v2187_v58 }
 0x2f6   : > { %v1525_v9 = vsel %vm1116_vm2, %v1524_v35, %v1523_v60  ;;  %vm1570_vm2 = vcmask 1040384  }
 0x2f8   : > { %v1486_v48 = vpop.permute.xlu2 %1485 }
 0x2f9   : > { %v1447_v49 = vld [vmem:[#allocation1] sm:$0xff]  ;;  %v1528_v3 = vperm.slane %v1486_v48, %v2196_v23 }
 0x2fa   : > { %1512 = vperm.xlu0 %1717, %v1447_v49   ;;  %1448 = vst [vmem:[#allocation1] ss:$9 sm:$0xff] %v1300_v37  ;;  %v1526_v37 = vperm.slane %v1483_v4, %v2193_v41  ;;  %v1150_v49 = vadd.s32 4294967216, %v2187_v58 }
 0x2fb   : > { %1449 = vst [vmem:[#allocation1 + $0x1] ss:$9 sm:$0xff] %v1301_v45  ;;  %v764_v45 = vmax.f32 %v763_v39, 0.0001 }
 0x2fc   : > { %1450 = vst [vmem:[#allocation1 + $0x2] ss:$9 sm:$0xff] %v1302_v5  ;;  %v1527_v5 = vsel %vm1120_vm3, %v1526_v37, %v1525_v9  ;;  %v1151_v57 = vperm.slane %v1095_v54, %v1150_v49  ;;  %vm1583_vm3 = vcmask 0  }
 0x2fd   : > { %1451 = vst [vmem:[#allocation1 + $0x3] ss:$9 sm:$0xff] %v1303_v8  ;;  %v1529_v41 = vsel %vm1124_vm4, %v1528_v3, %v1527_v5  ;;  %v2307_v44 = vmin.f32 %v764_v45, 0.9999 }
 0x2fe   : > { %1452 = vst [vmem:[#allocation1 + $0x4] ss:$9 sm:$0xff] %v1304_v62 }
 0x2ff   : > { %1453 = vst [vmem:[#allocation1 + $0x5] ss:$9 sm:$0xff] %v1305_v42  ;;  %1814 = vlog2.f32 %v2307_v44 }
 0x300   : > { %1454 = vst [vmem:[#allocation1 + $0x6] ss:$9 sm:$0xff] %v1306_v34  ;;  %v1489_v55 = vpop.permute.xlu2 %1488 }
 0x301   : > { %1455 = vst [vmem:[#allocation1 + $0x7] ss:$9 sm:$0xff] %v1307_v30  ;;  %v1530_v8 = vperm.slane %v1489_v55, %v2209_v51  ;;  %v1154_v30 = vadd.s32 4294967208, %v2187_v58  ;;  %v1158_v51 = vadd.s32 4294967200, %v2187_v58 }
 0x303   : > { %v1492_v15 = vpop.permute.xlu1 %1491 }
 0x304   : > { %v1532_v42 = vperm.slane %v1492_v15, %v2202_v53  ;;  %v1177_v53 = vsub.f32 1.0, %v2307_v44 }
 0x306   : > { %1816 = vlog2.f32 %v1177_v53 }
 0x308   : > { %v1456_v32 = vld [vmem:[#allocation1] sm:$0xff] }
 0x309   : > { %1515 = vperm.xlu2 %1715, %v1456_v32   ;;  %1457 = vst [vmem:[#allocation1] ss:$9 sm:$0xff] %v1308_v63  ;;  %v1498_v7 = vpop.permute.xlu2 %1497  ;;  %v1531_v63 = vsel %vm1128_vm5, %v1530_v8, %v1529_v41  ;;  %v1155_v32 = vperm.slane %v1098_v27, %v1154_v30  ;;  %v1564_v27 = vstv %s1667_s5 }
 0x30a   : > { %1458 = vst [vmem:[#allocation1 + $0x1] ss:$9 sm:$0xff] %v1309_v6  ;;  %v1533_v6 = vsel %vm1132_vm6, %v1532_v42, %v1531_v63 }
 0x30b   : > { %1459 = vst [vmem:[#allocation1 + $0x2] ss:$9 sm:$0xff] %v1310_v26 }
 0x30c   : > { %1460 = vst [vmem:[#allocation1 + $0x3] ss:$9 sm:$0xff] %v1311_v18  ;;  %v1162_v18 = vadd.s32 4294967192, %v2187_v58 }
 0x30d   : > { %1461 = vst [vmem:[#allocation1 + $0x4] ss:$9 sm:$0xff] %v1312_v21  ;;  %v1536_v21 = vperm.slane %v1498_v7, %v2230_v11 }
 0x30e   : > { %1462 = vst [vmem:[#allocation1 + $0x5] ss:$9 sm:$0xff] %v1313_v19 }
 0x30f   : > { %1463 = vst [vmem:[#allocation1 + $0x6] ss:$9 sm:$0xff] %v1314_v61  ;;  %v1153_v61 = vsel %vm1152_vm11, %v1151_v57, %v2238_v13  ;;  %v1163_v13 = vperm.slane %v2284_v33, %v1162_v18 }
 0x310   : > { %1464 = vst [vmem:[#allocation1 + $0x7] ss:$9 sm:$0xff] %v1315_v1  ;;  %v1166_v1 = vadd.s32 4294967184, %v2187_v58  ;;  %v1157_v11 = vsel %vm1156_vm12, %v1155_v32, %v1153_v61 }
 0x311   : > { %1109 = vperm.xlu2 %1715, %v2181_v59  }
 0x312   : > { %v1495_v29 = vpop.permute.xlu0 %1494 }
 0x313   : > { %v1534_v36 = vperm.slane %v1495_v29, %v2206_v14 }
 0x315   : > { %v1535_v26 = vsel %vm1136_vm7, %v1534_v36, %v1533_v6 }
 0x316   : > { %v1537_v22 = vsel %vm1140_vm8, %v1536_v21, %v1535_v26 }
 0x317   : > { %v1465_v38 = vld [vmem:[#allocation1] sm:$0xff] }
 0x318   : > { %1518 = vperm.xlu1 %1716, %v1465_v38   ;;  %1466 = vst [vmem:[#allocation1] ss:$9 sm:$0xff] %v1316_v56 }
 0x319   : > { %1467 = vst [vmem:[#allocation1 + $0x1] ss:$9 sm:$0xff] %v1317_v52 }
 0x31a   : > { %1468 = vst [vmem:[#allocation1 + $0x2] ss:$9 sm:$0xff] %v1318_v50 }
 0x31b   : > { %1469 = vst [vmem:[#allocation1 + $0x3] ss:$9 sm:$0xff] %v1319_v25 }
 0x31c   : > { %1470 = vst [vmem:[#allocation1 + $0x4] ss:$9 sm:$0xff] %v1320_v0  ;;  %v1167_v0 = vperm.slane %v2282_v31, %v1166_v1 }
 0x31d   : > { %1471 = vst [vmem:[#allocation1 + $0x5] ss:$9 sm:$0xff] %v1321_v24 }
 0x31e   : > { %1472 = vst [vmem:[#allocation1 + $0x6] ss:$9 sm:$0xff] %v1322_v12 }
 0x31f   : > { %1473 = vst [vmem:[#allocation1 + $0x7] ss:$9 sm:$0xff] %v1323_v2  ;;  %v1815_v2 = vpop.eup %1814 }
 0x320   : > { %v1817_v54 = vpop.eup %1816  ;;  %v767_v7 = vmul.f32 0.6931472, %v1815_v2 }
 0x321   : > { %v1179_v35 = vmul.f32 0.6931472, %v1817_v54 }
 0x326   : > { %v1474_v59 = vld [vmem:[#allocation1] sm:$0xff] }
 0x327   : > { %1521 = vperm.xlu0 %1717, %v1474_v59  }
 0x330   : > { %v1501_v47 = vpop.permute.xlu1 %1500 }
 0x331   : > { %v1538_v14 = vperm.slane %v1501_v47, %v2224_v17  ;;  %v2377_v17 = vlaneseq }
 0x333   : > { %v1562_v56 = vshrl.u32 %v2377_v17, 7  ;;  %v1539_v52 = vsel %vm1144_vm9, %v1538_v14, %v1537_v22 }
 0x335   : > { %v1563_v46 = vmul.u32 128, %v1562_v56 }
 0x336   : > { %v2286_v28 = vpop.permute.xlu2 %1506 }
 0x337   : > { %v1542_v24 = vperm.slane %v2286_v28, %v1150_v49  ;;  %v1565_v29 = vadd.s32 %v1564_v27, %v1563_v46 }
 0x339   : > { %v1566_v5 = vadd.s32 %v1565_v29, %v2187_v58  ;;  %v1569_v58 = vld [vmem:[%s1928_s29] sm:$0x1] }
 0x33b   : > { %vm1567_vm1 = vcmp.lt.s32.totalorder %v1566_v5, 500 }
 0x33f   : > { %v1504_v34 = vpop.permute.xlu0 %1503 }
 0x340   : > { %v1540_v19 = vperm.slane %v1504_v34, %v2227_v16  ;;  %v1159_v16 = vperm.slane %v2280_v43, %v1158_v51 }
 0x342   : > { %v1541_v50 = vsel %vm1148_vm10, %v1540_v19, %v1539_v52  ;;  %v1161_v4 = vsel %vm1160_vm13, %v1159_v16, %v1157_v11 }
 0x343   : > { %v1543_v48 = vsel %vm1152_vm11, %v1542_v24, %v1541_v50  ;;  %v1165_v55 = vsel %vm1164_vm14, %v1163_v13, %v1161_v4 }
 0x344   : > { %v1169_v31 = vsel %vm1168_vm15, %v1167_v0, %v1165_v55 }
 0x35d   : > { %v1510_v23 = vpop.permute.xlu1 %1509 }
 0x35e   : > { %v1544_v25 = vperm.slane %v1510_v23, %v1154_v30 }
 0x360   : > { %v1545_v33 = vsel %vm1156_vm12, %v1544_v25, %v1543_v48 }
 0x363   : > { %v2300_v62 = vpop.permute.xlu2 %1515 }
 0x364   : > { %v1548_v28 = vperm.slane %v2300_v62, %v1162_v18 }
 0x36b   : > { %v1110_v38 = vpop.permute.xlu2 %1109 }
 0x36c   : > { %v1513_v40 = vpop.permute.xlu0 %1512  ;;  %v1171_v59 = vperm.slane %v1110_v38, %v1170_v20 }
 0x36d   : > { %v1546_v12 = vperm.slane %v1513_v40, %v1158_v51 }
 0x36e   : > { %v1173_v60 = vsel %vm1172_vm0, %v1171_v59, %v1169_v31 }
 0x36f   : > { %v1547_v10 = vsel %vm1160_vm13, %v1546_v12, %v1545_v33  ;;  %v1175_v37 = vsub.f32 %v767_v7, %v1173_v60 }
 0x370   : > { %v1549_v9 = vsel %vm1164_vm14, %v1548_v28, %v1547_v10 }
 0x371   : > { %v1176_v3 = vmul.f32 %v1175_v37, %v2307_v44 }
 0x38a   : > { %v1519_v43 = vpop.permute.xlu1 %1518 }
 0x38b   : > { %v1550_v15 = vperm.slane %v1519_v43, %v1166_v1 }
 0x38d   : > { %v1551_v45 = vsel %vm1168_vm15, %v1550_v15, %v1549_v9 }
 0x399   : > { %v1522_v39 = vpop.permute.xlu0 %1521 }
 0x39a   : > { %v1552_v47 = vperm.slane %v1522_v39, %v1170_v20 }
 0x39c   : > { %v1553_v49 = vsel %vm1172_vm0, %v1552_v47, %v1551_v45 }
 0x39d   : > { %v1555_v8 = vsub.f32 %v1179_v35, %v1553_v49 }
 0x39f   : > { %v1556_v62 = vmul.f32 %v1555_v8, %v1177_v53 }
 0x3a1   : > { %v1557_v42 = vadd.f32 %v1556_v62, %v1176_v3 }
 0x3a3   : > { %v1568_v34 = vsel %vm1567_vm1, %v1557_v42, 0.0 }
 0x3a4   : > { %v1571_v30 = vsel %vm1570_vm2, %v1568_v34, 0.0 }
 0x3a5   : > { %1572 = vadd.xlane.f32.xlu1 %v1571_v30 }
 0x418   : > { %v1573_v36 = vpop.xlane.xlu1 %1572 }
 0x419   : > { %v1574_v41 = vrot.slane %v1573_v36, 4 }
 0x41b   : > { %v1575_v57 = vadd.f32 %v1574_v41, %v1573_v36 }
 0x41d   : > { %v1576_v63 = vrot.slane %v1575_v57, 2 }
 0x41f   : > { %v1577_v51 = vadd.f32 %v1576_v63, %v1575_v57 }
 0x421   : > { %v1578_v6 = vrot.slane %v1577_v51, 1 }
 0x423   : > { %v1579_v23 = vadd.f32 %v1578_v6, %v1577_v51 }
 0x425   : > { %1670 = vpush %v1579_v23 }
 0x456   : > { %s1671_s6 = spop %1670 }
 0x457   : > { %v1581_v44 = vstv %s1671_s6 }
 0x458   : > { %v1582_v53 = vadd.f32 %v1581_v44, %v1569_v58 }
 0x45a   : > { %1584 = vst.msk [vmem:[%s1928_s29] sm:$0x1] %vm1583_vm3, %v1582_v53 }
 0x45b PF: > { %s12_s13 = sadd.s32 1, %s1856_s13   ;;  %s2378_s9 = smov %s1848_s11 }
 0x45c   : > { %p9_p9 = scmp.ge.s32.totalorder %s12_s13, 6   ;;  %s2379_s10 = smov %s1852_s12 }
 0x45d   : > { %s2380_s11 = smov %s2383_s14  ;;  %s2381_s12 = smov %s2387_s15 }
 0x45e   :  { %11 = sbr.rel (!%p9_p9) target bundleno = 3 (0x3), region = 79 }

</bundles_post_ra>
